<compile_context>
chip_gen: v7x
topology: tpu7x:2x2x1
jax: 0.10.0
libtpu: 0.0.40
codegen_flags: <defaults>
</compile_context>

<pallas_src>
import functools
import math

import jax
import jax.numpy as jnp
import numpy as np
from jax import lax
from jax.experimental import pallas as pl
from jax.experimental.pallas import tpu as pltpu


# ----------------------------------------------------------------------------
# Fused Pallas kernel
# ----------------------------------------------------------------------------

def _dw3x3_from_padded(pad_ref, n, w_ref, d, pad, *, H, W, C):
    """Depthwise 3x3 conv (dilation d) reading the zero-padded VMEM scratch.

    Vertical taps are static shifted-row reads (the zero padding supplies the
    top/bottom border); horizontal taps are lane rolls by dx*C (XLU).  The
    horizontal border mask is baked into the tap weights host-side, which
    also zeroes the roll's wrap-around lanes.
    """
    WC = W * C
    acc = None
    for i in range(3):
        dy = (i - 1) * d
        base = pad_ref[n, pad + dy:pad + dy + H, :]
        for j in range(3):
            dx = (j - 1) * d
            t = base if dx == 0 else pltpu.roll(base, shift=(-dx * C) % WC,
                                                axis=1)
            term = t * w_ref[3 * i + j:3 * i + j + 1, :]
            acc = term if acc is None else acc + term
    return acc


def _conv_module_kernel(x_ref, w1_ref, w2_ref, m1_ref, m2_ref, sh_ref, o_ref,
                        pad_ref, *, NB, H, W, C, d2, pad):
    """NB batch elements, all four stages fused, everything VMEM-resident.

    x_ref:   (NB, H, W*C)        packed NHWC input (also the residual)
    w1_ref:  (9, W*C)            stage-1 dw taps (BN1_1 scale + dx mask folded)
    w2_ref:  (9, W*C)            stage-3 dilated dw taps (BN1_2 scale + dx mask)
    m1_ref:  (W*C, W*C)          block-diag masked 1x1 weight, BN2_1 scale folded
    m2_ref:  (W*C, W*C)          block-diag masked 1x1 weight, BN2_2 scale folded
    sh_ref:  (4, W*C)            fused BN shift rows [sh1, sh2, sh3, sh4]
    o_ref:   (NB, H, W*C)
    pad_ref: (NB, H+2*pad, W*C)  zero-padded staging scratch (VMEM)
    """
    WC = W * C
    HP = H + 2 * pad

    # BN shift rows -> locals, read/broadcast once.
    sh1 = sh_ref[0:1, :]
    sh2 = sh_ref[1:2, :]
    sh3 = sh_ref[2:3, :]
    sh4 = sh_ref[3:4, :]

    # Zero only the padding rows; payload rows are always overwritten below.
    for n in range(NB):
        pad_ref[n, 0:pad, :] = jnp.zeros((pad, WC), jnp.float32)
        pad_ref[n, pad + H:HP, :] = jnp.zeros((pad, WC), jnp.float32)

    # ---- stage 1: conv3x3_1 (depthwise) + BN1_1 + ReLU ----------------------
    for n in range(NB):
        pad_ref[n, pad:pad + H, :] = x_ref[n].astype(jnp.float32)
    parts = []
    for n in range(NB):
        yd = _dw3x3_from_padded(pad_ref, n, w1_ref, 1, pad, H=H, W=W, C=C)
        parts.append(jnp.maximum(yd + sh1, 0.0))
    y = parts[0] if NB == 1 else jnp.concatenate(parts, axis=0)   # (NB*H, WC)

    # ---- stage 2: conv1L_1 (masked 1x1 -> block-diag MXU matmul) + BN2_1 ----
    y = jnp.dot(y, m1_ref[...], preferred_element_type=jnp.float32) + sh2

    # ---- stage 3: conv3x3_2 (depthwise, dilated) + BN1_2 + ReLU -------------
    for n in range(NB):
        pad_ref[n, pad:pad + H, :] = y[n * H:(n + 1) * H, :]
    parts = []
    for n in range(NB):
        yd = _dw3x3_from_padded(pad_ref, n, w2_ref, d2, pad, H=H, W=W, C=C)
        parts.append(jnp.maximum(yd + sh3, 0.0))
    y = parts[0] if NB == 1 else jnp.concatenate(parts, axis=0)

    # ---- stage 4: conv1L_2 (masked 1x1) + BN2_2 + residual + ReLU -----------
    # TODO(synk): Dropout2d (p=0 here) and training-mode BatchNorm batch
    # statistics are not modeled; BN uses fused inference-mode scale/shift.
    y = jnp.dot(y, m2_ref[...], preferred_element_type=jnp.float32) + sh4
    for n in range(NB):
        res = x_ref[n].astype(jnp.float32)
        o_ref[n] = jnp.maximum(y[n * H:(n + 1) * H, :] + res,
                               0.0).astype(o_ref.dtype)


# ----------------------------------------------------------------------------
# Parameter packing (mask construction, BN fusion, lane packing) -- plain JAX
# ----------------------------------------------------------------------------

def group_mask_jax(groups, alpha, inC, outC):
    """JAX equivalent of group_mask, collapsed over the 1x1 kernel dims."""
    g_size = inC // groups
    a = jnp.arange(inC) // g_size
    b = jnp.arange(outC) // g_size
    same = a[:, None] == b[None, :]
    touched = (jnp.arange(inC)[:, None] < groups * g_size) & \
              (jnp.arange(outC)[None, :] < groups * g_size)
    m = jnp.where(same, 1.0, alpha)
    # TODO(synk): entries beyond groups*g_size keep torch.ones' default 1.0;
    # verify against MaskConv2d when inC is not divisible by groups.
    return jnp.where(touched, m, 1.0)


def fuse_bn(conv_bias, gamma, beta, mean, var, eps=1e-3):
    scale = gamma / jnp.sqrt(var + eps)
    shift = (conv_bias - mean) * scale + beta
    return scale, shift


def _pack_params(p, alpha, groups, W, dilated):
    C = p["b3_1"].shape[0]
    WC = W * C
    mask = group_mask_jax(groups, alpha, C, C)

    s1, sh1 = fuse_bn(p["b3_1"], *p["bn1_1"])
    s2, sh2 = fuse_bn(p["b1L_1"], *p["bn2_1"])
    s3, sh3 = fuse_bn(p["b3_2"], *p["bn1_2"])
    s4, sh4 = fuse_bn(p["b1L_2"], *p["bn2_2"])

    w_idx = jnp.arange(W)

    def pack_dw(w3, scale, d):
        # (3,3,C) taps * BN scale, tiled over W on the packed (w*C + c) lane
        # axis, with the horizontal (dx) border validity baked into the
        # weights (zero tap where w + dx is out of range).
        rows = []
        for i in range(3):
            for j in range(3):
                dx = (j - 1) * d
                if dx > 0:
                    lane_valid = (w_idx < W - dx).astype(jnp.float32)
                elif dx < 0:
                    lane_valid = (w_idx >= -dx).astype(jnp.float32)
                else:
                    lane_valid = jnp.ones((W,), jnp.float32)
                tap = w3[i, j, :] * scale                       # (C,)
                rows.append((lane_valid[:, None] * tap[None, :]).reshape(WC))
        return jnp.stack(rows)                                  # (9, WC)

    w1p = pack_dw(p["w3_1"], s1, 1)
    w2p = pack_dw(p["w3_2"], s3, dilated)

    # Masked 1x1 weights: stored (inC, outC, 1, 1) but used by F.conv2d as
    # (out, in); transpose to (in, out), apply the group mask, fold the BN
    # output scale into the output columns, then block-diagonalize across the
    # W positions of the packed lane axis -> a real 128x128 MXU operand.
    # (16x redundant data, but fetched once via a constant index_map.)
    wt1 = (p["w1L_1"][:, :, 0, 0] * mask).T * s2[None, :]
    wt2 = (p["w1L_2"][:, :, 0, 0] * mask).T * s4[None, :]
    eye = jnp.eye(W, dtype=jnp.float32)
    m1 = jnp.kron(eye, wt1)
    m2 = jnp.kron(eye, wt2)

    # Only the BN shift rows remain (scales are folded into the weights).
    shifts = jnp.stack([jnp.tile(v, W) for v in (sh1, sh2, sh3, sh4)])  # (4,WC)
    return w1p, w2p, m1, m2, shifts


# ----------------------------------------------------------------------------
# Wrapper: per-generation grid strategy + pallas_call
# ----------------------------------------------------------------------------

def _tensorcores_per_device():
    """Best-effort TensorCore count behind one JAX device (megacore chips)."""
    try:
        kind = jax.devices()[0].device_kind.lower()
    except Exception:
        return 1
    # v4 / v5p (megacore) and v7x expose 2 TensorCores per device; v5e/v6e
    # expose 1.  Unknown strings fall back to 1 (single grid step), which is
    # always correct.
    if any(tag in kind for tag in ("v4", "v5p", "v7", "7x")):
        return 2
    return 1


@functools.partial(jax.jit,
                   static_argnames=("alpha", "dilated", "groups", "num_chunks"))
def _conv_module_forward_impl(x_nhwc, params, *, alpha, dilated, groups,
                              num_chunks):
    N, H, W, C = x_nhwc.shape
    WC = W * C
    w1p, w2p, m1, m2, sh = _pack_params(params, alpha, groups, W, dilated)
    x_packed = x_nhwc.reshape(N, H, WC)

    NB = N // num_chunks                     # batch elements per grid step
    pad = max(1, dilated)                    # vertical halo for both stages
    kern = functools.partial(_conv_module_kernel, NB=NB, H=H, W=W, C=C,
                             d2=dilated, pad=pad)
    out = pl.pallas_call(
        kern,
        out_shape=jax.ShapeDtypeStruct((N, H, WC), x_nhwc.dtype),
        grid=(num_chunks,),
        in_specs=[
            pl.BlockSpec((NB, H, WC), lambda n: (n, 0, 0)),
            pl.BlockSpec((9, WC), lambda n: (0, 0)),
            pl.BlockSpec((9, WC), lambda n: (0, 0)),
            pl.BlockSpec((WC, WC), lambda n: (0, 0)),
            pl.BlockSpec((WC, WC), lambda n: (0, 0)),
            pl.BlockSpec((4, WC), lambda n: (0, 0)),
        ],
        out_specs=pl.BlockSpec((NB, H, WC), lambda n: (n, 0, 0)),
        scratch_shapes=[pltpu.VMEM((NB, H + 2 * pad, WC), jnp.float32)],
        compiler_params=pltpu.CompilerParams(
            dimension_semantics=("parallel",)),
    )(x_packed, w1p, w2p, m1, m2, sh)
    return out.reshape(N, H, W, C)


def conv_module_forward(x_nhwc, params, *, alpha, dilated, groups):
    N = x_nhwc.shape[0]
    num_chunks = _tensorcores_per_device()
    if num_chunks < 1 or N % num_chunks != 0:
        num_chunks = 1
    return _conv_module_forward_impl(x_nhwc, params, alpha=alpha,
                                     dilated=dilated, groups=groups,
                                     num_chunks=num_chunks)


# ----------------------------------------------------------------------------
# Pure-JAX reference (sanity check)
# ----------------------------------------------------------------------------

def ref_forward(x, p, alpha, dilated, groups, eps=1e-3):
    C = x.shape[-1]

    def dw(xx, w, b, d):
        k = w.reshape(3, 3, 1, C)
        y = lax.conv_general_dilated(
            xx, k, window_strides=(1, 1), padding=((d, d), (d, d)),
            rhs_dilation=(d, d), dimension_numbers=("NHWC", "HWIO", "NHWC"),
            feature_group_count=C)
        return y + b

    def bn(xx, gamma, beta, mean, var):
        return (xx - mean) / jnp.sqrt(var + eps) * gamma + beta

    mask = group_mask_jax(groups, alpha, C, C)
    y = jax.nn.relu(bn(dw(x, p["w3_1"], p["b3_1"], 1), *p["bn1_1"]))
    W1 = p["w1L_1"][:, :, 0, 0] * mask
    y = bn(jnp.einsum("nhwc,oc->nhwo", y, W1) + p["b1L_1"], *p["bn2_1"])
    y = jax.nn.relu(bn(dw(y, p["w3_2"], p["b3_2"], dilated), *p["bn1_2"]))
    W2 = p["w1L_2"][:, :, 0, 0] * mask
    y = bn(jnp.einsum("nhwc,oc->nhwo", y, W2) + p["b1L_2"], *p["bn2_2"])
    return jax.nn.relu(y + x)


# ----------------------------------------------------------------------------
# main
# ----------------------------------------------------------------------------

if __name__ == "__main__":
    N, C, H, W = 2, 8, 16, 16
    # alpha != 1 so the grouped-mask path is actually exercised.
    groups, dilated, dropprob, alpha = 2, 2, 0.0, 0.5

    key = jax.random.PRNGKey(0)
    ks = list(jax.random.split(key, 16))

    def u(k, shape, bound):
        return jax.random.uniform(k, shape, jnp.float32, -bound, bound)

    def bn_params(k):
        k1, k2, k3, k4 = jax.random.split(k, 4)
        gamma = jax.random.uniform(k1, (C,), jnp.float32, 0.5, 1.5)
        beta = jax.random.uniform(k2, (C,), jnp.float32, -0.5, 0.5)
        mean = jax.random.uniform(k3, (C,), jnp.float32, -0.5, 0.5)
        var = jax.random.uniform(k4, (C,), jnp.float32, 0.5, 1.5)
        return (gamma, beta, mean, var)

    b_dw = 1.0 / math.sqrt(1 * 3 * 3)     # PyTorch depthwise conv init bound
    b_1x1 = 1.0 / math.sqrt(C * 1 * 1)    # MaskConv2d init bound

    params = {
        # depthwise weights stored as (3, 3, C)
        "w3_1": u(ks[0], (3, 3, C), b_dw),
        "b3_1": u(ks[1], (C,), b_dw),
        "w3_2": u(ks[2], (3, 3, C), b_dw),
        "b3_2": u(ks[3], (C,), b_dw),
        # MaskConv2d weights: (inC, outC, 1, 1) exactly like the PyTorch param
        "w1L_1": u(ks[4], (C, C, 1, 1), b_1x1),
        "b1L_1": u(ks[5], (C,), b_1x1),
        "w1L_2": u(ks[6], (C, C, 1, 1), b_1x1),
        "b1L_2": u(ks[7], (C,), b_1x1),
        "bn1_1": bn_params(ks[8]),
        "bn2_1": bn_params(ks[9]),
        "bn1_2": bn_params(ks[10]),
        "bn2_2": bn_params(ks[11]),
    }

    # Input in PyTorch's NCHW convention, converted to NHWC for the kernel.
    x_nchw = jax.random.normal(ks[12], (N, C, H, W), jnp.float32)
    x_nhwc = jnp.transpose(x_nchw, (0, 2, 3, 1))

    out_nhwc = conv_module_forward(x_nhwc, params, alpha=alpha,
                                   dilated=dilated, groups=groups)
    out_nchw = jnp.transpose(out_nhwc, (0, 3, 1, 2))
    jax.block_until_ready(out_nchw)

    ref_nchw = jnp.transpose(
        ref_forward(x_nhwc, params, alpha, dilated, groups), (0, 3, 1, 2))
    np.testing.assert_allclose(np.asarray(out_nchw), np.asarray(ref_nchw),
                               rtol=1e-3, atol=1e-3)

    print("KERNEL_OK")
</pallas_src>

<mosaic_0001>
module attributes {stable_mosaic.version = 11 : i64} {
  func.func @_conv_module_kernel(%arg0: i32, %arg1: memref<2x16x128xf32, #tpu.memory_space<vmem>>, %arg2: memref<9x128xf32, #tpu.memory_space<vmem>>, %arg3: memref<9x128xf32, #tpu.memory_space<vmem>>, %arg4: memref<128x128xf32, #tpu.memory_space<vmem>>, %arg5: memref<128x128xf32, #tpu.memory_space<vmem>>, %arg6: memref<4x128xf32, #tpu.memory_space<vmem>>, %arg7: memref<2x16x128xf32, #tpu.memory_space<vmem>>, %arg8: memref<2x20x128xf32, #tpu.memory_space<vmem>>) attributes {dimension_semantics = [#tpu.dimension_semantics<parallel>], iteration_bounds = array<i64: 1>, scalar_prefetch = 0 : i64, scratch_operands = 1 : i64, tpu.core_type = #tpu.core_type<tc>, window_params = [{transform_indices = @transform_0, window_bounds = array<i64: 2, 16, 128>}, {pipeline_mode = #tpu.pipeline_mode<synchronous>, transform_indices = @transform_1, window_bounds = array<i64: 9, 128>}, {pipeline_mode = #tpu.pipeline_mode<synchronous>, transform_indices = @transform_2, window_bounds = array<i64: 9, 128>}, {pipeline_mode = #tpu.pipeline_mode<synchronous>, transform_indices = @transform_3, window_bounds = array<i64: 128, 128>}, {pipeline_mode = #tpu.pipeline_mode<synchronous>, transform_indices = @transform_4, window_bounds = array<i64: 128, 128>}, {pipeline_mode = #tpu.pipeline_mode<synchronous>, transform_indices = @transform_5, window_bounds = array<i64: 4, 128>}, {transform_indices = @transform_6, window_bounds = array<i64: 2, 16, 128>}]} {
    %c0 = arith.constant 0 : index
    %c0_0 = arith.constant 0 : index
    %0 = vector.load %arg6[%c0, %c0_0] : memref<4x128xf32, #tpu.memory_space<vmem>>, vector<1x128xf32>
    %c1 = arith.constant 1 : index
    %c0_1 = arith.constant 0 : index
    %1 = vector.load %arg6[%c1, %c0_1] : memref<4x128xf32, #tpu.memory_space<vmem>>, vector<1x128xf32>
    %c2 = arith.constant 2 : index
    %c0_2 = arith.constant 0 : index
    %2 = vector.load %arg6[%c2, %c0_2] : memref<4x128xf32, #tpu.memory_space<vmem>>, vector<1x128xf32>
    %c3 = arith.constant 3 : index
    %c0_3 = arith.constant 0 : index
    %3 = vector.load %arg6[%c3, %c0_3] : memref<4x128xf32, #tpu.memory_space<vmem>>, vector<1x128xf32>
    %cst = arith.constant 0.000000e+00 : f32
    %4 = vector.broadcast %cst : f32 to vector<2x128xf32>
    %c0_4 = arith.constant 0 : index
    %c0_5 = arith.constant 0 : index
    %c0_6 = arith.constant 0 : index
    %5 = vector.load %arg8[%c0_4, %c0_5, %c0_6] : memref<2x20x128xf32, #tpu.memory_space<vmem>>, vector<1x2x128xf32>
    %6 = vector.shape_cast %5 : vector<1x2x128xf32> to vector<2x128xf32>
    %7 = vector.shape_cast %4 : vector<2x128xf32> to vector<1x2x128xf32>
    tpu.vector_store %arg8[%c0_4, %c0_5, %c0_6], %7 {strides = array<i32>} : memref<2x20x128xf32, #tpu.memory_space<vmem>>, vector<1x2x128xf32>,
    %cst_7 = arith.constant 0.000000e+00 : f32
    %8 = vector.broadcast %cst_7 : f32 to vector<2x128xf32>
    %c0_8 = arith.constant 0 : index
    %c18 = arith.constant 18 : index
    %c0_9 = arith.constant 0 : index
    %9 = vector.load %arg8[%c0_8, %c18, %c0_9] : memref<2x20x128xf32, #tpu.memory_space<vmem>>, vector<1x2x128xf32>
    %10 = vector.shape_cast %9 : vector<1x2x128xf32> to vector<2x128xf32>
    %11 = vector.shape_cast %8 : vector<2x128xf32> to vector<1x2x128xf32>
    tpu.vector_store %arg8[%c0_8, %c18, %c0_9], %11 {strides = array<i32>} : memref<2x20x128xf32, #tpu.memory_space<vmem>>, vector<1x2x128xf32>,
    %cst_10 = arith.constant 0.000000e+00 : f32
    %12 = vector.broadcast %cst_10 : f32 to vector<2x128xf32>
    %c1_11 = arith.constant 1 : index
    %c0_12 = arith.constant 0 : index
    %c0_13 = arith.constant 0 : index
    %13 = vector.load %arg8[%c1_11, %c0_12, %c0_13] : memref<2x20x128xf32, #tpu.memory_space<vmem>>, vector<1x2x128xf32>
    %14 = vector.shape_cast %13 : vector<1x2x128xf32> to vector<2x128xf32>
    %15 = vector.shape_cast %12 : vector<2x128xf32> to vector<1x2x128xf32>
    tpu.vector_store %arg8[%c1_11, %c0_12, %c0_13], %15 {strides = array<i32>} : memref<2x20x128xf32, #tpu.memory_space<vmem>>, vector<1x2x128xf32>,
    %cst_14 = arith.constant 0.000000e+00 : f32
    %16 = vector.broadcast %cst_14 : f32 to vector<2x128xf32>
    %c1_15 = arith.constant 1 : index
    %c18_16 = arith.constant 18 : index
    %c0_17 = arith.constant 0 : index
    %17 = vector.load %arg8[%c1_15, %c18_16, %c0_17] : memref<2x20x128xf32, #tpu.memory_space<vmem>>, vector<1x2x128xf32>
    %18 = vector.shape_cast %17 : vector<1x2x128xf32> to vector<2x128xf32>
    %19 = vector.shape_cast %16 : vector<2x128xf32> to vector<1x2x128xf32>
    tpu.vector_store %arg8[%c1_15, %c18_16, %c0_17], %19 {strides = array<i32>} : memref<2x20x128xf32, #tpu.memory_space<vmem>>, vector<1x2x128xf32>,
    %c0_18 = arith.constant 0 : index
    %c0_19 = arith.constant 0 : index
    %c0_20 = arith.constant 0 : index
    %20 = vector.load %arg1[%c0_18, %c0_19, %c0_20] : memref<2x16x128xf32, #tpu.memory_space<vmem>>, vector<1x16x128xf32>
    %21 = vector.shape_cast %20 : vector<1x16x128xf32> to vector<16x128xf32>
    %c0_21 = arith.constant 0 : index
    %c2_22 = arith.constant 2 : index
    %c0_23 = arith.constant 0 : index
    %22 = vector.load %arg8[%c0_21, %c2_22, %c0_23] : memref<2x20x128xf32, #tpu.memory_space<vmem>>, vector<1x16x128xf32>
    %23 = vector.shape_cast %22 : vector<1x16x128xf32> to vector<16x128xf32>
    %24 = vector.shape_cast %21 : vector<16x128xf32> to vector<1x16x128xf32>
    tpu.vector_store %arg8[%c0_21, %c2_22, %c0_23], %24 {strides = array<i32>} : memref<2x20x128xf32, #tpu.memory_space<vmem>>, vector<1x16x128xf32>,
    %c1_24 = arith.constant 1 : index
    %c0_25 = arith.constant 0 : index
    %c0_26 = arith.constant 0 : index
    %25 = vector.load %arg1[%c1_24, %c0_25, %c0_26] : memref<2x16x128xf32, #tpu.memory_space<vmem>>, vector<1x16x128xf32>
    %26 = vector.shape_cast %25 : vector<1x16x128xf32> to vector<16x128xf32>
    %c1_27 = arith.constant 1 : index
    %c2_28 = arith.constant 2 : index
    %c0_29 = arith.constant 0 : index
    %27 = vector.load %arg8[%c1_27, %c2_28, %c0_29] : memref<2x20x128xf32, #tpu.memory_space<vmem>>, vector<1x16x128xf32>
    %28 = vector.shape_cast %27 : vector<1x16x128xf32> to vector<16x128xf32>
    %29 = vector.shape_cast %26 : vector<16x128xf32> to vector<1x16x128xf32>
    tpu.vector_store %arg8[%c1_27, %c2_28, %c0_29], %29 {strides = array<i32>} : memref<2x20x128xf32, #tpu.memory_space<vmem>>, vector<1x16x128xf32>,
    %c0_30 = arith.constant 0 : index
    %c1_31 = arith.constant 1 : index
    %c0_32 = arith.constant 0 : index
    %30 = vector.load %arg8[%c0_30, %c1_31, %c0_32] : memref<2x20x128xf32, #tpu.memory_space<vmem>>, vector<1x16x128xf32>
    %31 = vector.shape_cast %30 : vector<1x16x128xf32> to vector<16x128xf32>
    %c8_i32 = arith.constant 8 : i32
    %32 = tpu.dynamic_rotate %31 by %c8_i32 dim 1 : vector<16x128xf32>, i32 -> vector<16x128xf32>
    %c0_33 = arith.constant 0 : index
    %c0_34 = arith.constant 0 : index
    %33 = vector.load %arg2[%c0_33, %c0_34] : memref<9x128xf32, #tpu.memory_space<vmem>>, vector<1x128xf32>
    %34 = vector.broadcast %33 : vector<1x128xf32> to vector<16x128xf32>
    %35 = arith.mulf %32, %34 : vector<16x128xf32>
    %c1_35 = arith.constant 1 : index
    %c0_36 = arith.constant 0 : index
    %36 = vector.load %arg2[%c1_35, %c0_36] : memref<9x128xf32, #tpu.memory_space<vmem>>, vector<1x128xf32>
    %37 = vector.broadcast %36 : vector<1x128xf32> to vector<16x128xf32>
    %38 = arith.mulf %31, %37 : vector<16x128xf32>
    %39 = arith.addf %35, %38 : vector<16x128xf32>
    %c120_i32 = arith.constant 120 : i32
    %40 = tpu.dynamic_rotate %31 by %c120_i32 dim 1 : vector<16x128xf32>, i32 -> vector<16x128xf32>
    %c2_37 = arith.constant 2 : index
    %c0_38 = arith.constant 0 : index
    %41 = vector.load %arg2[%c2_37, %c0_38] : memref<9x128xf32, #tpu.memory_space<vmem>>, vector<1x128xf32>
    %42 = vector.broadcast %41 : vector<1x128xf32> to vector<16x128xf32>
    %43 = arith.mulf %40, %42 : vector<16x128xf32>
    %44 = arith.addf %39, %43 : vector<16x128xf32>
    %c0_39 = arith.constant 0 : index
    %c2_40 = arith.constant 2 : index
    %c0_41 = arith.constant 0 : index
    %45 = vector.load %arg8[%c0_39, %c2_40, %c0_41] : memref<2x20x128xf32, #tpu.memory_space<vmem>>, vector<1x16x128xf32>
    %46 = vector.shape_cast %45 : vector<1x16x128xf32> to vector<16x128xf32>
    %c8_i32_42 = arith.constant 8 : i32
    %47 = tpu.dynamic_rotate %46 by %c8_i32_42 dim 1 : vector<16x128xf32>, i32 -> vector<16x128xf32>
    %c3_43 = arith.constant 3 : index
    %c0_44 = arith.constant 0 : index
    %48 = vector.load %arg2[%c3_43, %c0_44] : memref<9x128xf32, #tpu.memory_space<vmem>>, vector<1x128xf32>
    %49 = vector.broadcast %48 : vector<1x128xf32> to vector<16x128xf32>
    %50 = arith.mulf %47, %49 : vector<16x128xf32>
    %51 = arith.addf %44, %50 : vector<16x128xf32>
    %c4 = arith.constant 4 : index
    %c0_45 = arith.constant 0 : index
    %52 = vector.load %arg2[%c4, %c0_45] : memref<9x128xf32, #tpu.memory_space<vmem>>, vector<1x128xf32>
    %53 = vector.broadcast %52 : vector<1x128xf32> to vector<16x128xf32>
    %54 = arith.mulf %46, %53 : vector<16x128xf32>
    %55 = arith.addf %51, %54 : vector<16x128xf32>
    %c120_i32_46 = arith.constant 120 : i32
    %56 = tpu.dynamic_rotate %46 by %c120_i32_46 dim 1 : vector<16x128xf32>, i32 -> vector<16x128xf32>
    %c5 = arith.constant 5 : index
    %c0_47 = arith.constant 0 : index
    %57 = vector.load %arg2[%c5, %c0_47] : memref<9x128xf32, #tpu.memory_space<vmem>>, vector<1x128xf32>
    %58 = vector.broadcast %57 : vector<1x128xf32> to vector<16x128xf32>
    %59 = arith.mulf %56, %58 : vector<16x128xf32>
    %60 = arith.addf %55, %59 : vector<16x128xf32>
    %c0_48 = arith.constant 0 : index
    %c3_49 = arith.constant 3 : index
    %c0_50 = arith.constant 0 : index
    %61 = vector.load %arg8[%c0_48, %c3_49, %c0_50] : memref<2x20x128xf32, #tpu.memory_space<vmem>>, vector<1x16x128xf32>
    %62 = vector.shape_cast %61 : vector<1x16x128xf32> to vector<16x128xf32>
    %c8_i32_51 = arith.constant 8 : i32
    %63 = tpu.dynamic_rotate %62 by %c8_i32_51 dim 1 : vector<16x128xf32>, i32 -> vector<16x128xf32>
    %c6 = arith.constant 6 : index
    %c0_52 = arith.constant 0 : index
    %64 = vector.load %arg2[%c6, %c0_52] : memref<9x128xf32, #tpu.memory_space<vmem>>, vector<1x128xf32>
    %65 = vector.broadcast %64 : vector<1x128xf32> to vector<16x128xf32>
    %66 = arith.mulf %63, %65 : vector<16x128xf32>
    %67 = arith.addf %60, %66 : vector<16x128xf32>
    %c7 = arith.constant 7 : index
    %c0_53 = arith.constant 0 : index
    %68 = vector.load %arg2[%c7, %c0_53] : memref<9x128xf32, #tpu.memory_space<vmem>>, vector<1x128xf32>
    %69 = vector.broadcast %68 : vector<1x128xf32> to vector<16x128xf32>
    %70 = arith.mulf %62, %69 : vector<16x128xf32>
    %71 = arith.addf %67, %70 : vector<16x128xf32>
    %c120_i32_54 = arith.constant 120 : i32
    %72 = tpu.dynamic_rotate %62 by %c120_i32_54 dim 1 : vector<16x128xf32>, i32 -> vector<16x128xf32>
    %c8 = arith.constant 8 : index
    %c0_55 = arith.constant 0 : index
    %73 = vector.load %arg2[%c8, %c0_55] : memref<9x128xf32, #tpu.memory_space<vmem>>, vector<1x128xf32>
    %74 = vector.broadcast %73 : vector<1x128xf32> to vector<16x128xf32>
    %75 = arith.mulf %72, %74 : vector<16x128xf32>
    %76 = arith.addf %71, %75 : vector<16x128xf32>
    %77 = vector.broadcast %0 : vector<1x128xf32> to vector<16x128xf32>
    %78 = arith.addf %76, %77 : vector<16x128xf32>
    %cst_56 = arith.constant 0.000000e+00 : f32
    %79 = vector.broadcast %cst_56 : f32 to vector<16x128xf32>
    %80 = arith.maximumf %78, %79 : vector<16x128xf32>
    %c1_57 = arith.constant 1 : index
    %c1_58 = arith.constant 1 : index
    %c0_59 = arith.constant 0 : index
    %81 = vector.load %arg8[%c1_57, %c1_58, %c0_59] : memref<2x20x128xf32, #tpu.memory_space<vmem>>, vector<1x16x128xf32>
    %82 = vector.shape_cast %81 : vector<1x16x128xf32> to vector<16x128xf32>
    %c8_i32_60 = arith.constant 8 : i32
    %83 = tpu.dynamic_rotate %82 by %c8_i32_60 dim 1 : vector<16x128xf32>, i32 -> vector<16x128xf32>
    %c0_61 = arith.constant 0 : index
    %c0_62 = arith.constant 0 : index
    %84 = vector.load %arg2[%c0_61, %c0_62] : memref<9x128xf32, #tpu.memory_space<vmem>>, vector<1x128xf32>
    %85 = vector.broadcast %84 : vector<1x128xf32> to vector<16x128xf32>
    %86 = arith.mulf %83, %85 : vector<16x128xf32>
    %c1_63 = arith.constant 1 : index
    %c0_64 = arith.constant 0 : index
    %87 = vector.load %arg2[%c1_63, %c0_64] : memref<9x128xf32, #tpu.memory_space<vmem>>, vector<1x128xf32>
    %88 = vector.broadcast %87 : vector<1x128xf32> to vector<16x128xf32>
    %89 = arith.mulf %82, %88 : vector<16x128xf32>
    %90 = arith.addf %86, %89 : vector<16x128xf32>
    %c120_i32_65 = arith.constant 120 : i32
    %91 = tpu.dynamic_rotate %82 by %c120_i32_65 dim 1 : vector<16x128xf32>, i32 -> vector<16x128xf32>
    %c2_66 = arith.constant 2 : index
    %c0_67 = arith.constant 0 : index
    %92 = vector.load %arg2[%c2_66, %c0_67] : memref<9x128xf32, #tpu.memory_space<vmem>>, vector<1x128xf32>
    %93 = vector.broadcast %92 : vector<1x128xf32> to vector<16x128xf32>
    %94 = arith.mulf %91, %93 : vector<16x128xf32>
    %95 = arith.addf %90, %94 : vector<16x128xf32>
    %c1_68 = arith.constant 1 : index
    %c2_69 = arith.constant 2 : index
    %c0_70 = arith.constant 0 : index
    %96 = vector.load %arg8[%c1_68, %c2_69, %c0_70] : memref<2x20x128xf32, #tpu.memory_space<vmem>>, vector<1x16x128xf32>
    %97 = vector.shape_cast %96 : vector<1x16x128xf32> to vector<16x128xf32>
    %c8_i32_71 = arith.constant 8 : i32
    %98 = tpu.dynamic_rotate %97 by %c8_i32_71 dim 1 : vector<16x128xf32>, i32 -> vector<16x128xf32>
    %c3_72 = arith.constant 3 : index
    %c0_73 = arith.constant 0 : index
    %99 = vector.load %arg2[%c3_72, %c0_73] : memref<9x128xf32, #tpu.memory_space<vmem>>, vector<1x128xf32>
    %100 = vector.broadcast %99 : vector<1x128xf32> to vector<16x128xf32>
    %101 = arith.mulf %98, %100 : vector<16x128xf32>
    %102 = arith.addf %95, %101 : vector<16x128xf32>
    %c4_74 = arith.constant 4 : index
    %c0_75 = arith.constant 0 : index
    %103 = vector.load %arg2[%c4_74, %c0_75] : memref<9x128xf32, #tpu.memory_space<vmem>>, vector<1x128xf32>
    %104 = vector.broadcast %103 : vector<1x128xf32> to vector<16x128xf32>
    %105 = arith.mulf %97, %104 : vector<16x128xf32>
    %106 = arith.addf %102, %105 : vector<16x128xf32>
    %c120_i32_76 = arith.constant 120 : i32
    %107 = tpu.dynamic_rotate %97 by %c120_i32_76 dim 1 : vector<16x128xf32>, i32 -> vector<16x128xf32>
    %c5_77 = arith.constant 5 : index
    %c0_78 = arith.constant 0 : index
    %108 = vector.load %arg2[%c5_77, %c0_78] : memref<9x128xf32, #tpu.memory_space<vmem>>, vector<1x128xf32>
    %109 = vector.broadcast %108 : vector<1x128xf32> to vector<16x128xf32>
    %110 = arith.mulf %107, %109 : vector<16x128xf32>
    %111 = arith.addf %106, %110 : vector<16x128xf32>
    %c1_79 = arith.constant 1 : index
    %c3_80 = arith.constant 3 : index
    %c0_81 = arith.constant 0 : index
    %112 = vector.load %arg8[%c1_79, %c3_80, %c0_81] : memref<2x20x128xf32, #tpu.memory_space<vmem>>, vector<1x16x128xf32>
    %113 = vector.shape_cast %112 : vector<1x16x128xf32> to vector<16x128xf32>
    %c8_i32_82 = arith.constant 8 : i32
    %114 = tpu.dynamic_rotate %113 by %c8_i32_82 dim 1 : vector<16x128xf32>, i32 -> vector<16x128xf32>
    %c6_83 = arith.constant 6 : index
    %c0_84 = arith.constant 0 : index
    %115 = vector.load %arg2[%c6_83, %c0_84] : memref<9x128xf32, #tpu.memory_space<vmem>>, vector<1x128xf32>
    %116 = vector.broadcast %115 : vector<1x128xf32> to vector<16x128xf32>
    %117 = arith.mulf %114, %116 : vector<16x128xf32>
    %118 = arith.addf %111, %117 : vector<16x128xf32>
    %c7_85 = arith.constant 7 : index
    %c0_86 = arith.constant 0 : index
    %119 = vector.load %arg2[%c7_85, %c0_86] : memref<9x128xf32, #tpu.memory_space<vmem>>, vector<1x128xf32>
    %120 = vector.broadcast %119 : vector<1x128xf32> to vector<16x128xf32>
    %121 = arith.mulf %113, %120 : vector<16x128xf32>
    %122 = arith.addf %118, %121 : vector<16x128xf32>
    %c120_i32_87 = arith.constant 120 : i32
    %123 = tpu.dynamic_rotate %113 by %c120_i32_87 dim 1 : vector<16x128xf32>, i32 -> vector<16x128xf32>
    %c8_88 = arith.constant 8 : index
    %c0_89 = arith.constant 0 : index
    %124 = vector.load %arg2[%c8_88, %c0_89] : memref<9x128xf32, #tpu.memory_space<vmem>>, vector<1x128xf32>
    %125 = vector.broadcast %124 : vector<1x128xf32> to vector<16x128xf32>
    %126 = arith.mulf %123, %125 : vector<16x128xf32>
    %127 = arith.addf %122, %126 : vector<16x128xf32>
    %128 = vector.broadcast %0 : vector<1x128xf32> to vector<16x128xf32>
    %129 = arith.addf %127, %128 : vector<16x128xf32>
    %cst_90 = arith.constant 0.000000e+00 : f32
    %130 = vector.broadcast %cst_90 : f32 to vector<16x128xf32>
    %131 = arith.maximumf %129, %130 : vector<16x128xf32>
    %132 = tpu.concatenate %80, %131 in 0 : vector<16x128xf32>, vector<16x128xf32> -> vector<32x128xf32>
    %c0_91 = arith.constant 0 : index
    %c0_92 = arith.constant 0 : index
    %133 = vector.load %arg4[%c0_91, %c0_92] : memref<128x128xf32, #tpu.memory_space<vmem>>, vector<128x128xf32>
    %cst_93 = arith.constant dense<0.000000e+00> : vector<32x128xf32>
    %134 = tpu.matmul %132, %133, %cst_93 {dimension_numbers = #tpu.dot_dimension_numbers<[1], [0], [0], [1], [0, 0, 1, 1], [], []>} : vector<32x128xf32>, vector<128x128xf32>, vector<32x128xf32> -> vector<32x128xf32>
    %135 = vector.broadcast %1 : vector<1x128xf32> to vector<32x128xf32>
    %136 = arith.addf %134, %135 : vector<32x128xf32>
    %137 = vector.extract_strided_slice %136 {offsets = [0, 0], sizes = [16, 128], strides = [1, 1]} : vector<32x128xf32> to vector<16x128xf32>
    %c0_94 = arith.constant 0 : index
    %c2_95 = arith.constant 2 : index
    %c0_96 = arith.constant 0 : index
    %138 = vector.load %arg8[%c0_94, %c2_95, %c0_96] : memref<2x20x128xf32, #tpu.memory_space<vmem>>, vector<1x16x128xf32>
    %139 = vector.shape_cast %138 : vector<1x16x128xf32> to vector<16x128xf32>
    %140 = vector.shape_cast %137 : vector<16x128xf32> to vector<1x16x128xf32>
    tpu.vector_store %arg8[%c0_94, %c2_95, %c0_96], %140 {strides = array<i32>} : memref<2x20x128xf32, #tpu.memory_space<vmem>>, vector<1x16x128xf32>,
    %141 = vector.extract_strided_slice %136 {offsets = [16, 0], sizes = [16, 128], strides = [1, 1]} : vector<32x128xf32> to vector<16x128xf32>
    %c1_97 = arith.constant 1 : index
    %c2_98 = arith.constant 2 : index
    %c0_99 = arith.constant 0 : index
    %142 = vector.load %arg8[%c1_97, %c2_98, %c0_99] : memref<2x20x128xf32, #tpu.memory_space<vmem>>, vector<1x16x128xf32>
    %143 = vector.shape_cast %142 : vector<1x16x128xf32> to vector<16x128xf32>
    %144 = vector.shape_cast %141 : vector<16x128xf32> to vector<1x16x128xf32>
    tpu.vector_store %arg8[%c1_97, %c2_98, %c0_99], %144 {strides = array<i32>} : memref<2x20x128xf32, #tpu.memory_space<vmem>>, vector<1x16x128xf32>,
    %c0_100 = arith.constant 0 : index
    %c0_101 = arith.constant 0 : index
    %c0_102 = arith.constant 0 : index
    %145 = vector.load %arg8[%c0_100, %c0_101, %c0_102] : memref<2x20x128xf32, #tpu.memory_space<vmem>>, vector<1x16x128xf32>
    %146 = vector.shape_cast %145 : vector<1x16x128xf32> to vector<16x128xf32>
    %c16_i32 = arith.constant 16 : i32
    %147 = tpu.dynamic_rotate %146 by %c16_i32 dim 1 : vector<16x128xf32>, i32 -> vector<16x128xf32>
    %c0_103 = arith.constant 0 : index
    %c0_104 = arith.constant 0 : index
    %148 = vector.load %arg3[%c0_103, %c0_104] : memref<9x128xf32, #tpu.memory_space<vmem>>, vector<1x128xf32>
    %149 = vector.broadcast %148 : vector<1x128xf32> to vector<16x128xf32>
    %150 = arith.mulf %147, %149 : vector<16x128xf32>
    %c1_105 = arith.constant 1 : index
    %c0_106 = arith.constant 0 : index
    %151 = vector.load %arg3[%c1_105, %c0_106] : memref<9x128xf32, #tpu.memory_space<vmem>>, vector<1x128xf32>
    %152 = vector.broadcast %151 : vector<1x128xf32> to vector<16x128xf32>
    %153 = arith.mulf %146, %152 : vector<16x128xf32>
    %154 = arith.addf %150, %153 : vector<16x128xf32>
    %c112_i32 = arith.constant 112 : i32
    %155 = tpu.dynamic_rotate %146 by %c112_i32 dim 1 : vector<16x128xf32>, i32 -> vector<16x128xf32>
    %c2_107 = arith.constant 2 : index
    %c0_108 = arith.constant 0 : index
    %156 = vector.load %arg3[%c2_107, %c0_108] : memref<9x128xf32, #tpu.memory_space<vmem>>, vector<1x128xf32>
    %157 = vector.broadcast %156 : vector<1x128xf32> to vector<16x128xf32>
    %158 = arith.mulf %155, %157 : vector<16x128xf32>
    %159 = arith.addf %154, %158 : vector<16x128xf32>
    %c0_109 = arith.constant 0 : index
    %c2_110 = arith.constant 2 : index
    %c0_111 = arith.constant 0 : index
    %160 = vector.load %arg8[%c0_109, %c2_110, %c0_111] : memref<2x20x128xf32, #tpu.memory_space<vmem>>, vector<1x16x128xf32>
    %161 = vector.shape_cast %160 : vector<1x16x128xf32> to vector<16x128xf32>
    %c16_i32_112 = arith.constant 16 : i32
    %162 = tpu.dynamic_rotate %161 by %c16_i32_112 dim 1 : vector<16x128xf32>, i32 -> vector<16x128xf32>
    %c3_113 = arith.constant 3 : index
    %c0_114 = arith.constant 0 : index
    %163 = vector.load %arg3[%c3_113, %c0_114] : memref<9x128xf32, #tpu.memory_space<vmem>>, vector<1x128xf32>
    %164 = vector.broadcast %163 : vector<1x128xf32> to vector<16x128xf32>
    %165 = arith.mulf %162, %164 : vector<16x128xf32>
    %166 = arith.addf %159, %165 : vector<16x128xf32>
    %c4_115 = arith.constant 4 : index
    %c0_116 = arith.constant 0 : index
    %167 = vector.load %arg3[%c4_115, %c0_116] : memref<9x128xf32, #tpu.memory_space<vmem>>, vector<1x128xf32>
    %168 = vector.broadcast %167 : vector<1x128xf32> to vector<16x128xf32>
    %169 = arith.mulf %161, %168 : vector<16x128xf32>
    %170 = arith.addf %166, %169 : vector<16x128xf32>
    %c112_i32_117 = arith.constant 112 : i32
    %171 = tpu.dynamic_rotate %161 by %c112_i32_117 dim 1 : vector<16x128xf32>, i32 -> vector<16x128xf32>
    %c5_118 = arith.constant 5 : index
    %c0_119 = arith.constant 0 : index
    %172 = vector.load %arg3[%c5_118, %c0_119] : memref<9x128xf32, #tpu.memory_space<vmem>>, vector<1x128xf32>
    %173 = vector.broadcast %172 : vector<1x128xf32> to vector<16x128xf32>
    %174 = arith.mulf %171, %173 : vector<16x128xf32>
    %175 = arith.addf %170, %174 : vector<16x128xf32>
    %c0_120 = arith.constant 0 : index
    %c4_121 = arith.constant 4 : index
    %c0_122 = arith.constant 0 : index
    %176 = vector.load %arg8[%c0_120, %c4_121, %c0_122] : memref<2x20x128xf32, #tpu.memory_space<vmem>>, vector<1x16x128xf32>
    %177 = vector.shape_cast %176 : vector<1x16x128xf32> to vector<16x128xf32>
    %c16_i32_123 = arith.constant 16 : i32
    %178 = tpu.dynamic_rotate %177 by %c16_i32_123 dim 1 : vector<16x128xf32>, i32 -> vector<16x128xf32>
    %c6_124 = arith.constant 6 : index
    %c0_125 = arith.constant 0 : index
    %179 = vector.load %arg3[%c6_124, %c0_125] : memref<9x128xf32, #tpu.memory_space<vmem>>, vector<1x128xf32>
    %180 = vector.broadcast %179 : vector<1x128xf32> to vector<16x128xf32>
    %181 = arith.mulf %178, %180 : vector<16x128xf32>
    %182 = arith.addf %175, %181 : vector<16x128xf32>
    %c7_126 = arith.constant 7 : index
    %c0_127 = arith.constant 0 : index
    %183 = vector.load %arg3[%c7_126, %c0_127] : memref<9x128xf32, #tpu.memory_space<vmem>>, vector<1x128xf32>
    %184 = vector.broadcast %183 : vector<1x128xf32> to vector<16x128xf32>
    %185 = arith.mulf %177, %184 : vector<16x128xf32>
    %186 = arith.addf %182, %185 : vector<16x128xf32>
    %c112_i32_128 = arith.constant 112 : i32
    %187 = tpu.dynamic_rotate %177 by %c112_i32_128 dim 1 : vector<16x128xf32>, i32 -> vector<16x128xf32>
    %c8_129 = arith.constant 8 : index
    %c0_130 = arith.constant 0 : index
    %188 = vector.load %arg3[%c8_129, %c0_130] : memref<9x128xf32, #tpu.memory_space<vmem>>, vector<1x128xf32>
    %189 = vector.broadcast %188 : vector<1x128xf32> to vector<16x128xf32>
    %190 = arith.mulf %187, %189 : vector<16x128xf32>
    %191 = arith.addf %186, %190 : vector<16x128xf32>
    %192 = vector.broadcast %2 : vector<1x128xf32> to vector<16x128xf32>
    %193 = arith.addf %191, %192 : vector<16x128xf32>
    %cst_131 = arith.constant 0.000000e+00 : f32
    %194 = vector.broadcast %cst_131 : f32 to vector<16x128xf32>
    %195 = arith.maximumf %193, %194 : vector<16x128xf32>
    %c1_132 = arith.constant 1 : index
    %c0_133 = arith.constant 0 : index
    %c0_134 = arith.constant 0 : index
    %196 = vector.load %arg8[%c1_132, %c0_133, %c0_134] : memref<2x20x128xf32, #tpu.memory_space<vmem>>, vector<1x16x128xf32>
    %197 = vector.shape_cast %196 : vector<1x16x128xf32> to vector<16x128xf32>
    %c16_i32_135 = arith.constant 16 : i32
    %198 = tpu.dynamic_rotate %197 by %c16_i32_135 dim 1 : vector<16x128xf32>, i32 -> vector<16x128xf32>
    %c0_136 = arith.constant 0 : index
    %c0_137 = arith.constant 0 : index
    %199 = vector.load %arg3[%c0_136, %c0_137] : memref<9x128xf32, #tpu.memory_space<vmem>>, vector<1x128xf32>
    %200 = vector.broadcast %199 : vector<1x128xf32> to vector<16x128xf32>
    %201 = arith.mulf %198, %200 : vector<16x128xf32>
    %c1_138 = arith.constant 1 : index
    %c0_139 = arith.constant 0 : index
    %202 = vector.load %arg3[%c1_138, %c0_139] : memref<9x128xf32, #tpu.memory_space<vmem>>, vector<1x128xf32>
    %203 = vector.broadcast %202 : vector<1x128xf32> to vector<16x128xf32>
    %204 = arith.mulf %197, %203 : vector<16x128xf32>
    %205 = arith.addf %201, %204 : vector<16x128xf32>
    %c112_i32_140 = arith.constant 112 : i32
    %206 = tpu.dynamic_rotate %197 by %c112_i32_140 dim 1 : vector<16x128xf32>, i32 -> vector<16x128xf32>
    %c2_141 = arith.constant 2 : index
    %c0_142 = arith.constant 0 : index
    %207 = vector.load %arg3[%c2_141, %c0_142] : memref<9x128xf32, #tpu.memory_space<vmem>>, vector<1x128xf32>
    %208 = vector.broadcast %207 : vector<1x128xf32> to vector<16x128xf32>
    %209 = arith.mulf %206, %208 : vector<16x128xf32>
    %210 = arith.addf %205, %209 : vector<16x128xf32>
    %c1_143 = arith.constant 1 : index
    %c2_144 = arith.constant 2 : index
    %c0_145 = arith.constant 0 : index
    %211 = vector.load %arg8[%c1_143, %c2_144, %c0_145] : memref<2x20x128xf32, #tpu.memory_space<vmem>>, vector<1x16x128xf32>
    %212 = vector.shape_cast %211 : vector<1x16x128xf32> to vector<16x128xf32>
    %c16_i32_146 = arith.constant 16 : i32
    %213 = tpu.dynamic_rotate %212 by %c16_i32_146 dim 1 : vector<16x128xf32>, i32 -> vector<16x128xf32>
    %c3_147 = arith.constant 3 : index
    %c0_148 = arith.constant 0 : index
    %214 = vector.load %arg3[%c3_147, %c0_148] : memref<9x128xf32, #tpu.memory_space<vmem>>, vector<1x128xf32>
    %215 = vector.broadcast %214 : vector<1x128xf32> to vector<16x128xf32>
    %216 = arith.mulf %213, %215 : vector<16x128xf32>
    %217 = arith.addf %210, %216 : vector<16x128xf32>
    %c4_149 = arith.constant 4 : index
    %c0_150 = arith.constant 0 : index
    %218 = vector.load %arg3[%c4_149, %c0_150] : memref<9x128xf32, #tpu.memory_space<vmem>>, vector<1x128xf32>
    %219 = vector.broadcast %218 : vector<1x128xf32> to vector<16x128xf32>
    %220 = arith.mulf %212, %219 : vector<16x128xf32>
    %221 = arith.addf %217, %220 : vector<16x128xf32>
    %c112_i32_151 = arith.constant 112 : i32
    %222 = tpu.dynamic_rotate %212 by %c112_i32_151 dim 1 : vector<16x128xf32>, i32 -> vector<16x128xf32>
    %c5_152 = arith.constant 5 : index
    %c0_153 = arith.constant 0 : index
    %223 = vector.load %arg3[%c5_152, %c0_153] : memref<9x128xf32, #tpu.memory_space<vmem>>, vector<1x128xf32>
    %224 = vector.broadcast %223 : vector<1x128xf32> to vector<16x128xf32>
    %225 = arith.mulf %222, %224 : vector<16x128xf32>
    %226 = arith.addf %221, %225 : vector<16x128xf32>
    %c1_154 = arith.constant 1 : index
    %c4_155 = arith.constant 4 : index
    %c0_156 = arith.constant 0 : index
    %227 = vector.load %arg8[%c1_154, %c4_155, %c0_156] : memref<2x20x128xf32, #tpu.memory_space<vmem>>, vector<1x16x128xf32>
    %228 = vector.shape_cast %227 : vector<1x16x128xf32> to vector<16x128xf32>
    %c16_i32_157 = arith.constant 16 : i32
    %229 = tpu.dynamic_rotate %228 by %c16_i32_157 dim 1 : vector<16x128xf32>, i32 -> vector<16x128xf32>
    %c6_158 = arith.constant 6 : index
    %c0_159 = arith.constant 0 : index
    %230 = vector.load %arg3[%c6_158, %c0_159] : memref<9x128xf32, #tpu.memory_space<vmem>>, vector<1x128xf32>
    %231 = vector.broadcast %230 : vector<1x128xf32> to vector<16x128xf32>
    %232 = arith.mulf %229, %231 : vector<16x128xf32>
    %233 = arith.addf %226, %232 : vector<16x128xf32>
    %c7_160 = arith.constant 7 : index
    %c0_161 = arith.constant 0 : index
    %234 = vector.load %arg3[%c7_160, %c0_161] : memref<9x128xf32, #tpu.memory_space<vmem>>, vector<1x128xf32>
    %235 = vector.broadcast %234 : vector<1x128xf32> to vector<16x128xf32>
    %236 = arith.mulf %228, %235 : vector<16x128xf32>
    %237 = arith.addf %233, %236 : vector<16x128xf32>
    %c112_i32_162 = arith.constant 112 : i32
    %238 = tpu.dynamic_rotate %228 by %c112_i32_162 dim 1 : vector<16x128xf32>, i32 -> vector<16x128xf32>
    %c8_163 = arith.constant 8 : index
    %c0_164 = arith.constant 0 : index
    %239 = vector.load %arg3[%c8_163, %c0_164] : memref<9x128xf32, #tpu.memory_space<vmem>>, vector<1x128xf32>
    %240 = vector.broadcast %239 : vector<1x128xf32> to vector<16x128xf32>
    %241 = arith.mulf %238, %240 : vector<16x128xf32>
    %242 = arith.addf %237, %241 : vector<16x128xf32>
    %243 = vector.broadcast %2 : vector<1x128xf32> to vector<16x128xf32>
    %244 = arith.addf %242, %243 : vector<16x128xf32>
    %cst_165 = arith.constant 0.000000e+00 : f32
    %245 = vector.broadcast %cst_165 : f32 to vector<16x128xf32>
    %246 = arith.maximumf %244, %245 : vector<16x128xf32>
    %247 = tpu.concatenate %195, %246 in 0 : vector<16x128xf32>, vector<16x128xf32> -> vector<32x128xf32>
    %c0_166 = arith.constant 0 : index
    %c0_167 = arith.constant 0 : index
    %248 = vector.load %arg5[%c0_166, %c0_167] : memref<128x128xf32, #tpu.memory_space<vmem>>, vector<128x128xf32>
    %cst_168 = arith.constant dense<0.000000e+00> : vector<32x128xf32>
    %249 = tpu.matmul %247, %248, %cst_168 {dimension_numbers = #tpu.dot_dimension_numbers<[1], [0], [0], [1], [0, 0, 1, 1], [], []>} : vector<32x128xf32>, vector<128x128xf32>, vector<32x128xf32> -> vector<32x128xf32>
    %250 = vector.broadcast %3 : vector<1x128xf32> to vector<32x128xf32>
    %251 = arith.addf %249, %250 : vector<32x128xf32>
    %c0_169 = arith.constant 0 : index
    %c0_170 = arith.constant 0 : index
    %c0_171 = arith.constant 0 : index
    %252 = vector.load %arg1[%c0_169, %c0_170, %c0_171] : memref<2x16x128xf32, #tpu.memory_space<vmem>>, vector<1x16x128xf32>
    %253 = vector.shape_cast %252 : vector<1x16x128xf32> to vector<16x128xf32>
    %254 = vector.extract_strided_slice %251 {offsets = [0, 0], sizes = [16, 128], strides = [1, 1]} : vector<32x128xf32> to vector<16x128xf32>
    %255 = arith.addf %254, %253 : vector<16x128xf32>
    %cst_172 = arith.constant 0.000000e+00 : f32
    %256 = vector.broadcast %cst_172 : f32 to vector<16x128xf32>
    %257 = arith.maximumf %255, %256 : vector<16x128xf32>
    %c0_173 = arith.constant 0 : index
    %c0_174 = arith.constant 0 : index
    %c0_175 = arith.constant 0 : index
    %258 = vector.load %arg7[%c0_173, %c0_174, %c0_175] : memref<2x16x128xf32, #tpu.memory_space<vmem>>, vector<1x16x128xf32>
    %259 = vector.shape_cast %258 : vector<1x16x128xf32> to vector<16x128xf32>
    %260 = vector.shape_cast %257 : vector<16x128xf32> to vector<1x16x128xf32>
    tpu.vector_store %arg7[%c0_173, %c0_174, %c0_175], %260 {strides = array<i32>} : memref<2x16x128xf32, #tpu.memory_space<vmem>>, vector<1x16x128xf32>,
    %c1_176 = arith.constant 1 : index
    %c0_177 = arith.constant 0 : index
    %c0_178 = arith.constant 0 : index
    %261 = vector.load %arg1[%c1_176, %c0_177, %c0_178] : memref<2x16x128xf32, #tpu.memory_space<vmem>>, vector<1x16x128xf32>
    %262 = vector.shape_cast %261 : vector<1x16x128xf32> to vector<16x128xf32>
    %263 = vector.extract_strided_slice %251 {offsets = [16, 0], sizes = [16, 128], strides = [1, 1]} : vector<32x128xf32> to vector<16x128xf32>
    %264 = arith.addf %263, %262 : vector<16x128xf32>
    %cst_179 = arith.constant 0.000000e+00 : f32
    %265 = vector.broadcast %cst_179 : f32 to vector<16x128xf32>
    %266 = arith.maximumf %264, %265 : vector<16x128xf32>
    %c1_180 = arith.constant 1 : index
    %c0_181 = arith.constant 0 : index
    %c0_182 = arith.constant 0 : index
    %267 = vector.load %arg7[%c1_180, %c0_181, %c0_182] : memref<2x16x128xf32, #tpu.memory_space<vmem>>, vector<1x16x128xf32>
    %268 = vector.shape_cast %267 : vector<1x16x128xf32> to vector<16x128xf32>
    %269 = vector.shape_cast %266 : vector<16x128xf32> to vector<1x16x128xf32>
    tpu.vector_store %arg7[%c1_180, %c0_181, %c0_182], %269 {strides = array<i32>} : memref<2x16x128xf32, #tpu.memory_space<vmem>>, vector<1x16x128xf32>,
    return
  }
  func.func @transform_0(%arg0: i32) -> (i32, i32, i32) {
    %c0_i32 = arith.constant 0 : i32
    %c0_i32_0 = arith.constant 0 : i32
    %c0_i32_1 = arith.constant 0 : i32
    return %arg0, %c0_i32, %c0_i32_0 : i32, i32, i32
  }
  func.func @transform_1(%arg0: i32) -> (i32, i32) {
    %c0_i32 = arith.constant 0 : i32
    %c0_i32_0 = arith.constant 0 : i32
    %c0_i32_1 = arith.constant 0 : i32
    return %c0_i32, %c0_i32_0 : i32, i32
  }
  func.func @transform_2(%arg0: i32) -> (i32, i32) {
    %c0_i32 = arith.constant 0 : i32
    %c0_i32_0 = arith.constant 0 : i32
    %c0_i32_1 = arith.constant 0 : i32
    return %c0_i32, %c0_i32_0 : i32, i32
  }
  func.func @transform_3(%arg0: i32) -> (i32, i32) {
    %c0_i32 = arith.constant 0 : i32
    %c0_i32_0 = arith.constant 0 : i32
    %c0_i32_1 = arith.constant 0 : i32
    return %c0_i32, %c0_i32_0 : i32, i32
  }
  func.func @transform_4(%arg0: i32) -> (i32, i32) {
    %c0_i32 = arith.constant 0 : i32
    %c0_i32_0 = arith.constant 0 : i32
    %c0_i32_1 = arith.constant 0 : i32
    return %c0_i32, %c0_i32_0 : i32, i32
  }
  func.func @transform_5(%arg0: i32) -> (i32, i32) {
    %c0_i32 = arith.constant 0 : i32
    %c0_i32_0 = arith.constant 0 : i32
    %c0_i32_1 = arith.constant 0 : i32
    return %c0_i32, %c0_i32_0 : i32, i32
  }
  func.func @transform_6(%arg0: i32) -> (i32, i32, i32) {
    %c0_i32 = arith.constant 0 : i32
    %c0_i32_0 = arith.constant 0 : i32
    %c0_i32_1 = arith.constant 0 : i32
    return %arg0, %c0_i32, %c0_i32_0 : i32, i32, i32
  }
}

</mosaic_0001>

<bundles_post_ra>
// kernel: mul.223
= control target key start
LH: loop header
LB: loop body
LE: loop exit
PB: predicated region body
PF: predicated region fallthrough
CT: control target
= control target key end

     0   :  { %s28_s0 = inlined_call_operand.vmem [shape: f32[8], index: 0, kind: input, shape index: {}]   ;;  %s29_s1 = inlined_call_operand.vmem [shape: f32[16,8], index: 1, kind: output, shape index: {}]  }
   0x1   :  { %v4_v0 = vld [vmem:[%s28_s0] ss:$0 sm:$0xff] }
   0x2   :  { %5 = vst [vmem:[%s29_s1] sm:$0xff] %v4_v0  ;;  %8 = vst [vmem:[%s29_s1 + $0x8] sm:$0xff] %v4_v0 }

// kernel: _conv_module_forward_impl.1
= control target key start
LH: loop header
LB: loop body
LE: loop exit
PB: predicated region body
PF: predicated region fallthrough
CT: control target
= control target key end

     0   :  { %v859_v0 = vmov 0.0   ;;  %s860_s29 = smov 120   ;;  %s861_s30 = smov 8   ;;  %s1277_s0 = inlined_call_operand.vmem [shape: f32[2,16,128], index: 0, kind: input, shape index: {}]   ;;  %s1278_s3 = inlined_call_operand.vmem [shape: f32[128,128], index: 3, kind: input, shape index: {}]   ;;  %s1279_s1 = inlined_call_operand.vmem [shape: f32[9,128], index: 1, kind: input, shape index: {}]   ;;  %s1280_s5 = inlined_call_operand.vmem [shape: f32[4,128], index: 5, kind: input, shape index: {}]   ;;  %s1281_s4 = inlined_call_operand.vmem [shape: f32[128,128], index: 4, kind: input, shape index: {}]   ;;  %s1282_s2 = inlined_call_operand.vmem [shape: f32[9,128], index: 2, kind: input, shape index: {}]   ;;  %s1283_s6 = inlined_call_operand.vmem [shape: f32[2,16,128], index: 6, kind: output, shape index: {}]  }
   0x1   :  { %27 = vst [vmem:[#allocation2] sm:$0x3] %v859_v0  ;;  %v902_v1 = vld [vmem:[%s1277_s0] sm:$0xff]  ;;  %28 = vst [vmem:[#allocation2 + $0x12] sm:$0x3] %v859_v0  ;;  %v907_v2 = vld [vmem:[%s1277_s0 + $0x8] sm:$0xff] }
   0x2   :  { %30 = vst [vmem:[#allocation2 + $0x18] sm:$0x3] %v859_v0  ;;  %31 = vst [vmem:[#allocation2 + $0x2a] sm:$0x3] %v859_v0  ;;  %v912_v3 = vld [vmem:[%s1277_s0 + $0x10] sm:$0xff]  ;;  %v920_v4 = vld [vmem:[%s1277_s0 + $0x18] sm:$0xff] }
   0x3   :  { %34 = vst [vmem:[#allocation2 + $0x2] sm:$0xff] %v902_v1  ;;  %35 = vst [vmem:[#allocation2 + $0xa] sm:$0xff] %v907_v2  ;;  %v226_v7 = vld [vmem:[%s1278_s3] sm:$0xff]  ;;  %v227_v8 = vld [vmem:[%s1278_s3 + $0x8] sm:$0xff]  ;;  %s862_s10 = smov 16  }
   0x4   :  { %39 = vst [vmem:[#allocation2 + $0x1a] sm:$0xff] %v912_v3  ;;  %40 = vst [vmem:[#allocation2 + $0x22] sm:$0xff] %v920_v4  ;;  %v790_v9 = vpack.c.bf16 %v227_v8, %v226_v7  ;;  %v228_v10 = vld [vmem:[%s1278_s3 + $0x10] sm:$0xff]  ;;  %v229_v11 = vld [vmem:[%s1278_s3 + $0x18] sm:$0xff] }
   0x5   :  { %v794_v13 = vpack.c.bf16 %v229_v11, %v228_v10  ;;  %v230_v14 = vld [vmem:[%s1278_s3 + $0x20] sm:$0xff]  ;;  %v231_v15 = vld [vmem:[%s1278_s3 + $0x28] sm:$0xff]  ;;  %v232_v18 = vld [vmem:[%s1278_s3 + $0x30] sm:$0xff] }
   0x6   :  { %791 = vmatprep.subr.bf16.mxu0 %v790_v9  ;;  %v798_v17 = vpack.c.bf16 %v231_v15, %v230_v14  ;;  %v233_v19 = vld [vmem:[%s1278_s3 + $0x38] sm:$0xff]  ;;  %v234_v21 = vld [vmem:[%s1278_s3 + $0x40] sm:$0xff]  ;;  %v235_v22 = vld [vmem:[%s1278_s3 + $0x48] sm:$0xff] }
   0x7   :  { %793 = vmatpush3.bf16.msra.mxu0 %v790_v9  ;;  %v802_v20 = vpack.c.bf16 %v233_v19, %v232_v18  ;;  %v806_v23 = vpack.c.bf16 %v235_v22, %v234_v21  ;;  %v236_v24 = vld [vmem:[%s1278_s3 + $0x50] sm:$0xff]  ;;  %v237_v25 = vld [vmem:[%s1278_s3 + $0x58] sm:$0xff]  ;;  %v238_v27 = vld [vmem:[%s1278_s3 + $0x60] sm:$0xff] }
   0x8   :  { %795 = vmatprep.subr.bf16.mxu0 %v794_v13  ;;  %v810_v26 = vpack.c.bf16 %v237_v25, %v236_v24  ;;  %v239_v28 = vld [vmem:[%s1278_s3 + $0x68] sm:$0xff]  ;;  %v240_v32 = vld [vmem:[%s1278_s3 + $0x70] sm:$0xff]  ;;  %v241_v33 = vld [vmem:[%s1278_s3 + $0x78] sm:$0xff]  ;;  %s863_s3 = smov 112  }
   0x9   :  { %v814_v31 = vpack.c.bf16 %v239_v28, %v238_v27  ;;  %v818_v34 = vpack.c.bf16 %v241_v33, %v240_v32  ;;  %v648_v43 = vld [vmem:[%s1279_s1] ss:$0 sm:$0xff]  ;;  %v649_v44 = vld [vmem:[%s1279_s1 + $0x1] ss:$0 sm:$0xff]  ;;  %v650_v49 = vld [vmem:[%s1279_s1 + $0x2] ss:$0 sm:$0xff] }
   0xa   :  { %v923_v5 = vld [vmem:[#allocation2 + $0x1] sm:$0xff]  ;;  %v929_v6 = vld [vmem:[#allocation2 + $0x9] sm:$0xff] }
   0xb   :  { %63 = vrot.lane.b32.xlu1 %v923_v5, %s860_s29  ;;  %43 = vrot.lane.b32.xlu0 %v923_v5, %s861_s30  ;;  %v947_v12 = vld [vmem:[#allocation2 + $0x19] sm:$0xff]  ;;  %v959_v16 = vld [vmem:[#allocation2 + $0x21] sm:$0xff]  ;;  %v1001_v29 = vld [vmem:[#allocation2 + $0xb] sm:$0xff]  ;;  %v59_v48 = vmul.f32 %v649_v44, %v923_v5  ;;  %v60_v52 = vmul.f32 %v649_v44, %v929_v6 }
   0xc   :  { %797 = vmatpush3.bf16.msra.mxu0 %v794_v13  ;;  %v1003_v30 = vld [vmem:[#allocation2 + $0x3] sm:$0xff]  ;;  %v1019_v35 = vld [vmem:[#allocation2 + $0x1b] sm:$0xff]  ;;  %v166_v62 = vmul.f32 %v649_v44, %v947_v12 }
   0xd   :  { %799 = vmatprep.subr.bf16.mxu0 %v798_v17  ;;  %v1025_v36 = vld [vmem:[#allocation2 + $0x23] sm:$0xff] }
   0xe   :  { %v651_v54 = vld [vmem:[%s1279_s1 + $0x3] ss:$0 sm:$0xff]  ;;  %v652_v0 = vld [vmem:[%s1279_s1 + $0x4] ss:$0 sm:$0xff]  ;;  %v653_v9 = vld [vmem:[%s1279_s1 + $0x5] ss:$0 sm:$0xff] }
   0xf   :  { %65 = vrot.lane.b32.xlu1 %v929_v6, %s860_s29  ;;  %45 = vrot.lane.b32.xlu0 %v929_v6, %s861_s30  ;;  %v167_v6 = vmul.f32 %v649_v44, %v959_v16  ;;  %v96_v14 = vmul.f32 %v652_v0, %v902_v1  ;;  %v654_v18 = vld [vmem:[%s1279_s1 + $0x6] ss:$0 sm:$0xff]  ;;  %v655_v32 = vld [vmem:[%s1279_s1 + $0x7] ss:$0 sm:$0xff] }
  0x10   :  { %801 = vmatpush3.bf16.msra.mxu0 %v798_v17 }
  0x11   :  { %803 = vmatprep.subr.bf16.mxu0 %v802_v20 }
  0x13   :  { %160 = vrot.lane.b32.xlu1 %v947_v12, %s861_s30  ;;  %78 = vrot.lane.b32.xlu0 %v902_v1, %s861_s30 }
  0x14   :  { %805 = vmatpush3.bf16.msra.mxu0 %v802_v20 }
  0x15   :  { %807 = vmatprep.subr.bf16.mxu0 %v806_v23 }
  0x17   :  { %162 = vrot.lane.b32.xlu1 %v959_v16, %s861_s30  ;;  %80 = vrot.lane.b32.xlu0 %v907_v2, %s861_s30 }
  0x18   :  { %809 = vmatpush3.bf16.msra.mxu0 %v806_v23  ;;  %v97_v23 = vmul.f32 %v652_v0, %v907_v2 }
  0x19   :  { %811 = vmatprep.subr.bf16.mxu0 %v810_v26 }
  0x1b   :  { %172 = vrot.lane.b32.xlu1 %v959_v16, %s860_s29  ;;  %170 = vrot.lane.b32.xlu0 %v947_v12, %s860_s29 }
  0x1c   :  { %813 = vmatpush3.bf16.msra.mxu0 %v810_v26 }
  0x1d   :  { %815 = vmatprep.subr.bf16.mxu0 %v814_v31 }
  0x1f   :  { %180 = vrot.lane.b32.xlu1 %v912_v3, %s861_s30  ;;  %100 = vrot.lane.b32.xlu0 %v902_v1, %s860_s29 }
  0x20   :  { %817 = vmatpush3.bf16.msra.mxu0 %v814_v31 }
  0x21   :  { %819 = vmatprep.subr.bf16.mxu0 %v818_v34 }
  0x23   :  { %182 = vrot.lane.b32.xlu1 %v920_v4, %s861_s30  ;;  %102 = vrot.lane.b32.xlu0 %v907_v2, %s860_s29 }
  0x24   :  { %821 = vmatpush3.bf16.msra.mxu0 %v818_v34 }
  0x27   :  { %117 = vrot.lane.b32.xlu1 %v1001_v29, %s861_s30  ;;  %115 = vrot.lane.b32.xlu0 %v1003_v30, %s861_s30 }
  0x2b   :  { %194 = vrot.lane.b32.xlu1 %v920_v4, %s860_s29  ;;  %192 = vrot.lane.b32.xlu0 %v912_v3, %s860_s29 }
  0x2f   :  { %202 = vrot.lane.b32.xlu1 %v1019_v35, %s861_s30  ;;  %137 = vrot.lane.b32.xlu0 %v1003_v30, %s860_s29 }
  0x33   :  { %204 = vrot.lane.b32.xlu1 %v1025_v36, %s861_s30  ;;  %139 = vrot.lane.b32.xlu0 %v1001_v29, %s860_s29 }
  0x37   :  { %216 = vrot.lane.b32.xlu1 %v1025_v36, %s860_s29  ;;  %214 = vrot.lane.b32.xlu0 %v1019_v35, %s860_s29 }
  0x7d   :  { %v64_v37 = vpop.permute.xlu1 %63  ;;  %v44_v38 = vpop.permute.xlu0 %43 }
  0x7e   :  { %v52_v47 = vmul.f32 %v648_v43, %v44_v38  ;;  %v72_v55 = vmul.f32 %v650_v49, %v64_v37 }
  0x80   :  { %v61_v56 = vadd.f32 %v59_v48, %v52_v47  ;;  %v656_v48 = vld [vmem:[%s1279_s1 + $0x8] ss:$0 sm:$0xff] }
  0x81   :  { %v66_v39 = vpop.permute.xlu1 %65  ;;  %v46_v40 = vpop.permute.xlu0 %45 }
  0x82   :  { %v53_v53 = vmul.f32 %v648_v43, %v46_v40  ;;  %v73_v60 = vmul.f32 %v650_v49, %v66_v39  ;;  %v74_v5 = vadd.f32 %v72_v55, %v61_v56  ;;  %v134_v55 = vmul.f32 %v655_v32, %v1001_v29 }
  0x84   :  { %v62_v61 = vadd.f32 %v60_v52, %v53_v53 }
  0x85   :  { %v161_v41 = vpop.permute.xlu1 %160  ;;  %v79_v42 = vpop.permute.xlu0 %78 }
  0x86   :  { %v87_v59 = vmul.f32 %v651_v54, %v79_v42  ;;  %v164_v63 = vmul.f32 %v648_v43, %v161_v41  ;;  %v75_v15 = vadd.f32 %v73_v60, %v62_v61  ;;  %v188_v42 = vmul.f32 %v652_v0, %v912_v3  ;;  %v657_v60 = vld [vmem:[%s1280_s5] ss:$0 sm:$0xff] }
  0x88   :  { %v89_v13 = vadd.f32 %v87_v59, %v74_v5  ;;  %v168_v12 = vadd.f32 %v166_v62, %v164_v63 }
  0x89   :  { %v163_v45 = vpop.permute.xlu1 %162  ;;  %v81_v46 = vpop.permute.xlu0 %80 }
  0x8a   :  { %v165_v7 = vmul.f32 %v648_v43, %v163_v45  ;;  %v88_v8 = vmul.f32 %v651_v54, %v81_v46  ;;  %v98_v26 = vadd.f32 %v96_v14, %v89_v13  ;;  %v133_v45 = vmul.f32 %v655_v32, %v1003_v30 }
  0x8c   :  { %v169_v19 = vadd.f32 %v167_v6, %v165_v7  ;;  %v90_v21 = vadd.f32 %v88_v8, %v75_v15  ;;  %v211_v7 = vmul.f32 %v655_v32, %v1025_v36  ;;  %v210_v8 = vmul.f32 %v655_v32, %v1019_v35 }
  0x8d   :  { %v173_v50 = vpop.permute.xlu1 %172  ;;  %v171_v51 = vpop.permute.xlu0 %170 }
  0x8e   :  { %v174_v17 = vmul.f32 %v650_v49, %v171_v51  ;;  %v175_v16 = vmul.f32 %v650_v49, %v173_v50  ;;  %v99_v39 = vadd.f32 %v97_v23, %v90_v21  ;;  %v189_v50 = vmul.f32 %v652_v0, %v920_v4 }
  0x90   :  { %v176_v28 = vadd.f32 %v174_v17, %v168_v12  ;;  %v177_v33 = vadd.f32 %v175_v16, %v169_v19 }
  0x91   :  { %v181_v57 = vpop.permute.xlu1 %180  ;;  %v101_v58 = vpop.permute.xlu0 %100 }
  0x92   :  { %v109_v20 = vmul.f32 %v653_v9, %v101_v58  ;;  %v184_v22 = vmul.f32 %v651_v54, %v181_v57 }
  0x94   :  { %v111_v34 = vadd.f32 %v109_v20, %v98_v26  ;;  %v186_v38 = vadd.f32 %v184_v22, %v176_v28 }
  0x95   :  { %v183_v10 = vpop.permute.xlu1 %182  ;;  %v103_v11 = vpop.permute.xlu0 %102 }
  0x96   :  { %v110_v31 = vmul.f32 %v653_v9, %v103_v11  ;;  %v185_v37 = vmul.f32 %v651_v54, %v183_v10  ;;  %v190_v52 = vadd.f32 %v188_v42, %v186_v38 }
  0x98   :  { %v112_v46 = vadd.f32 %v110_v31, %v99_v39  ;;  %v187_v49 = vadd.f32 %v185_v37, %v177_v33  ;;  %v521_v37 = vld [vmem:[%s1281_s4 + $0x8] sm:$0xff] }
  0x99   :  { %v118_v24 = vpop.permute.xlu1 %117  ;;  %v116_v25 = vpop.permute.xlu0 %115 }
  0x9a   :  { %v124_v27 = vmul.f32 %v654_v18, %v116_v25  ;;  %v125_v40 = vmul.f32 %v654_v18, %v118_v24  ;;  %v191_v61 = vadd.f32 %v189_v50, %v187_v49  ;;  %v525_v49 = vld [vmem:[%s1281_s4 + $0x28] sm:$0xff] }
  0x9c   :  { %v126_v44 = vadd.f32 %v124_v27, %v111_v34  ;;  %v127_v51 = vadd.f32 %v125_v40, %v112_v46  ;;  %v658_v27 = vld [vmem:[%s1280_s5 + $0x1] ss:$0 sm:$0xff] }
  0x9d   :  { %v195_v41 = vpop.permute.xlu1 %194  ;;  %v193_v43 = vpop.permute.xlu0 %192  ;;  %v520_v34 = vld [vmem:[%s1281_s4] sm:$0xff] }
  0x9e   :  { %v196_v47 = vmul.f32 %v653_v9, %v193_v43  ;;  %v197_v56 = vmul.f32 %v653_v9, %v195_v41  ;;  %v135_v59 = vadd.f32 %v133_v45, %v126_v44  ;;  %v136_v0 = vadd.f32 %v134_v55, %v127_v51  ;;  %v522_v43 = vld [vmem:[%s1281_s4 + $0x10] sm:$0xff]  ;;  %v523_v44 = vld [vmem:[%s1281_s4 + $0x18] sm:$0xff]  ;;  %v528_v55 = vld [vmem:[%s1281_s4 + $0x40] sm:$0xff] }
  0x9f   :  { %v822_v39 = vpack.c.bf16 %v521_v37, %v520_v34  ;;  %v826_v45 = vpack.c.bf16 %v523_v44, %v522_v43 }
  0xa0   :  { %v198_v30 = vadd.f32 %v196_v47, %v190_v52  ;;  %v199_v29 = vadd.f32 %v197_v56, %v191_v61  ;;  %v526_v52 = vld [vmem:[%s1281_s4 + $0x30] sm:$0xff]  ;;  %v529_v56 = vld [vmem:[%s1281_s4 + $0x48] sm:$0xff]  ;;  %v532_v61 = vld [vmem:[%s1281_s4 + $0x60] sm:$0xff] }
  0xa1   :  { %v203_v53 = vpop.permute.xlu1 %202  ;;  %v138_v54 = vpop.permute.xlu0 %137  ;;  %823 = vmatprep.subr.bf16.mxu1 %v822_v39 }
  0xa2   :  { %v206_v57 = vmul.f32 %v654_v18, %v203_v53  ;;  %v146_v58 = vmul.f32 %v656_v48, %v138_v54  ;;  %825 = vmatpush3.bf16.msra.mxu1 %v822_v39  ;;  %v527_v53 = vld [vmem:[%s1281_s4 + $0x38] sm:$0xff] }
  0xa3   :  { %827 = vmatprep.subr.bf16.mxu1 %v826_v45  ;;  %v834_v54 = vpack.c.bf16 %v527_v53, %v526_v52  ;;  %v666_v53 = vld [vmem:[%s1282_s2 + $0x7] ss:$0 sm:$0xff] }
  0xa4   :  { %v148_v62 = vadd.f32 %v146_v58, %v135_v59  ;;  %v208_v63 = vadd.f32 %v206_v57, %v198_v30  ;;  %v838_v57 = vpack.c.bf16 %v529_v56, %v528_v55  ;;  %v530_v58 = vld [vmem:[%s1281_s4 + $0x50] sm:$0xff]  ;;  %v531_v59 = vld [vmem:[%s1281_s4 + $0x58] sm:$0xff] }
  0xa5   :  { %v205_v5 = vpop.permute.xlu1 %204  ;;  %v140_v6 = vpop.permute.xlu0 %139  ;;  %v842_v30 = vpack.c.bf16 %v531_v59, %v530_v58 }
  0xa6   :  { %v207_v9 = vmul.f32 %v654_v18, %v205_v5  ;;  %v147_v10 = vmul.f32 %v656_v48, %v140_v6  ;;  %v154_v11 = vadd.f32 %v657_v60, %v148_v62  ;;  %v212_v17 = vadd.f32 %v210_v8, %v208_v63  ;;  %829 = vmatpush3.bf16.msra.mxu1 %v826_v45  ;;  %v533_v62 = vld [vmem:[%s1281_s4 + $0x68] sm:$0xff]  ;;  %v535_v6 = vld [vmem:[%s1281_s4 + $0x78] sm:$0xff] }
  0xa7   :  { %v846_v63 = vpack.c.bf16 %v533_v62, %v532_v61 }
  0xa8   :  { %v209_v13 = vadd.f32 %v207_v9, %v199_v29  ;;  %v149_v14 = vadd.f32 %v147_v10, %v136_v0  ;;  %v156_v12 = vmax.f32 %v154_v11, 0.0  ;;  %v534_v0 = vld [vmem:[%s1281_s4 + $0x70] sm:$0xff] }
  0xa9   :  { %v217_v15 = vpop.permute.xlu1 %216  ;;  %v215_v19 = vpop.permute.xlu0 %214 }
  0xaa   :  { %v213_v16 = vadd.f32 %v211_v7, %v209_v13  ;;  %v219_v20 = vmul.f32 %v656_v48, %v217_v15  ;;  %v218_v21 = vmul.f32 %v656_v48, %v215_v19  ;;  %746 = vmatprep.mubr.f32.mxu0 %v156_v12  ;;  %v155_v22 = vadd.f32 %v657_v60, %v149_v14  ;;  %v524_v48 = vld [vmem:[%s1281_s4 + $0x20] sm:$0xff] }
  0xab   :  { %v830_v50 = vpack.c.bf16 %v525_v49, %v524_v48  ;;  %v850_v7 = vpack.c.bf16 %v535_v6, %v534_v0  ;;  %v659_v14 = vld [vmem:[%s1282_s2] ss:$0 sm:$0xff]  ;;  %v660_v15 = vld [vmem:[%s1282_s2 + $0x1] ss:$0 sm:$0xff]  ;;  %v1233_v49 = vld [vmem:[%s1282_s2 + $0x6] ss:$0 sm:$0xff] }
  0xac   :  { %v221_v23 = vadd.f32 %v219_v20, %v213_v16  ;;  %v220_v24 = vadd.f32 %v218_v21, %v212_v17  ;;  %v157_v36 = vmax.f32 %v155_v22, 0.0  ;;  %v661_v17 = vld [vmem:[%s1282_s2 + $0x2] ss:$0 sm:$0xff] }
  0xad   :  { %831 = vmatprep.subr.bf16.mxu1 %v830_v50 }
  0xae   :  { %747 = vmatmul.mubr.f32.vlgmr.msra.gmra.mrb[0].mxu0 %v157_v36  ;;  %v222_v35 = vadd.f32 %v657_v60, %v220_v24  ;;  %v223_v25 = vadd.f32 %v657_v60, %v221_v23  ;;  %833 = vmatpush3.bf16.msra.mxu1 %v830_v50  ;;  %v662_v36 = vld [vmem:[%s1282_s2 + $0x3] ss:$0 sm:$0xff] }
  0xaf   :  { %835 = vmatprep.subr.bf16.mxu1 %v834_v54 }
  0xb0   :  { %v224_v18 = vmax.f32 %v222_v35, 0.0  ;;  %v225_v26 = vmax.f32 %v223_v25, 0.0 }
  0xb2   :  { %749 = vmatprep.mubr.f32.mxu0 %v224_v18  ;;  %837 = vmatpush3.bf16.msra.mxu1 %v834_v54  ;;  %v1221_v18 = vld [vmem:[%s1282_s2 + $0x4] ss:$0 sm:$0xff] }
  0xb3   :  { %750 = vmatmul.mubr.f32.gmra.mrb[2].mxu0 %v225_v26  ;;  %839 = vmatprep.subr.bf16.mxu1 %v838_v57 }
  0xb6   :  { %841 = vmatpush3.bf16.msra.mxu1 %v838_v57 }
  0xb7   :  { %843 = vmatprep.subr.bf16.mxu1 %v842_v30 }
  0xba   :  { %845 = vmatpush3.bf16.msra.mxu1 %v842_v30  ;;  %v667_v30 = vld [vmem:[%s1282_s2 + $0x8] ss:$0 sm:$0xff] }
  0xbb   :  { %847 = vmatprep.subr.bf16.mxu1 %v846_v63 }
  0xbe   :  { %849 = vmatpush3.bf16.msra.mxu1 %v846_v63 }
  0xbf   :  { %851 = vmatprep.subr.bf16.mxu1 %v850_v7 }
  0xc2   :  { %853 = vmatpush3.bf16.msra.mxu1 %v850_v7 }
 0x181   :  { %v748_v28 = vpop.f32.mrb[0].mxu0 }
 0x182   :  { %v1080_v31 = vadd.f32 %v748_v28, %v658_v27  ;;  %v312_v32 = vpop.f32.mrb[1].mxu0 }
 0x183   :  { %v1082_v33 = vadd.f32 %v658_v27, %v312_v32 }
 0x184   :  { %332 = vst [vmem:[#allocation2 + $0xa] sm:$0xff] %v1080_v31  ;;  %374 = vrot.lane.b32.xlu0 %v1080_v31, %s862_s10  ;;  %v391_v45 = vmul.f32 %v1221_v18, %v1080_v31 }
 0x185   :  { %331 = vst [vmem:[#allocation2 + $0x2] sm:$0xff] %v1082_v33  ;;  %v390_v39 = vmul.f32 %v1221_v18, %v1082_v33 }
 0x186   :  { %v751_v38 = vpop.f32.mrb[2].mxu0 }
 0x187   :  { %v1094_v40 = vadd.f32 %v751_v38, %v658_v27  ;;  %v322_v41 = vpop.f32.mrb[3].mxu0 }
 0x188   :  { %v1096_v42 = vadd.f32 %v658_v27, %v322_v41  ;;  %396 = vrot.lane.b32.xlu0 %v1080_v31, %s863_s3  ;;  %v664_v41 = vld [vmem:[%s1282_s2 + $0x5] ss:$0 sm:$0xff] }
 0x189   :  { %334 = vst [vmem:[#allocation2 + $0x22] sm:$0xff] %v1094_v40 }
 0x18a   :  { %333 = vst [vmem:[#allocation2 + $0x1a] sm:$0xff] %v1096_v42 }
 0x18b   :  { %v1108_v46 = vld [vmem:[#allocation2 + $0xc] sm:$0xff] }
 0x18c   :  { %411 = vrot.lane.b32.xlu1 %v1108_v46, %s862_s10  ;;  %v1112_v47 = vld [vmem:[#allocation2] sm:$0xff]  ;;  %v1122_v51 = vld [vmem:[#allocation2 + $0x8] sm:$0xff]  ;;  %v428_v59 = vmul.f32 %v666_v53, %v1108_v46 }
 0x18d   :  { %337 = vrot.lane.b32.xlu0 %v1112_v47, %s862_s10  ;;  %v1156_v60 = vld [vmem:[#allocation2 + $0x4] sm:$0xff]  ;;  %v353_v22 = vmul.f32 %v660_v15, %v1112_v47  ;;  %v354_v24 = vmul.f32 %v660_v15, %v1122_v51 }
 0x18e   :  { %v427_v62 = vmul.f32 %v666_v53, %v1156_v60 }
 0x190   :  { %339 = vrot.lane.b32.xlu1 %v1122_v51, %s862_s10  ;;  %v1198_v9 = vld [vmem:[#allocation2 + $0x24] sm:$0xff] }
 0x191   :  { %357 = vrot.lane.b32.xlu0 %v1112_v47, %s863_s3  ;;  %v1166_v5 = vld [vmem:[#allocation2 + $0x18] sm:$0xff]  ;;  %v1178_v8 = vld [vmem:[#allocation2 + $0x20] sm:$0xff] }
 0x192   :  { %v1192_v29 = vld [vmem:[#allocation2 + $0x1c] sm:$0xff] }
 0x194   :  { %359 = vrot.lane.b32.xlu1 %v1122_v51, %s863_s3 }
 0x195   :  { %372 = vrot.lane.b32.xlu0 %v1082_v33, %s862_s10 }
 0x198   :  { %476 = vrot.lane.b32.xlu1 %v1094_v40, %s862_s10 }
 0x199   :  { %394 = vrot.lane.b32.xlu0 %v1082_v33, %s863_s3 }
 0x19c   :  { %488 = vrot.lane.b32.xlu1 %v1094_v40, %s863_s3 }
 0x19d   :  { %409 = vrot.lane.b32.xlu0 %v1156_v60, %s862_s10 }
 0x1a0   :  { %454 = vrot.lane.b32.xlu1 %v1166_v5, %s862_s10 }
 0x1a1   :  { %431 = vrot.lane.b32.xlu0 %v1156_v60, %s863_s3 }
 0x1a4   :  { %456 = vrot.lane.b32.xlu1 %v1178_v8, %s862_s10 }
 0x1a5   :  { %464 = vrot.lane.b32.xlu0 %v1166_v5, %s863_s3 }
 0x1a8   :  { %466 = vrot.lane.b32.xlu1 %v1178_v8, %s863_s3 }
 0x1a9   :  { %486 = vrot.lane.b32.xlu0 %v1096_v42, %s863_s3 }
 0x1ac   :  { %474 = vrot.lane.b32.xlu1 %v1096_v42, %s862_s10 }
 0x1ad   :  { %433 = vrot.lane.b32.xlu0 %v1108_v46, %s863_s3 }
 0x1b0   :  { %496 = vrot.lane.b32.xlu1 %v1192_v29, %s862_s10 }
 0x1b1   :  { %508 = vrot.lane.b32.xlu0 %v1192_v29, %s863_s3 }
 0x1b4   :  { %498 = vrot.lane.b32.xlu1 %v1198_v9, %s862_s10 }
 0x1b8   :  { %510 = vrot.lane.b32.xlu1 %v1198_v9, %s863_s3 }
 0x1f6   :  { %v375_v10 = vpop.permute.xlu0 %374 }
 0x1f7   :  { %v382_v37 = vmul.f32 %v662_v36, %v375_v10 }
 0x1fa   :  { %v397_v11 = vpop.permute.xlu0 %396 }
 0x1fb   :  { %v404_v52 = vmul.f32 %v664_v41, %v397_v11 }
 0x1fe   :  { %v412_v13 = vpop.permute.xlu1 %411 }
 0x1ff   :  { %v338_v12 = vpop.permute.xlu0 %337  ;;  %v419_v55 = vmul.f32 %v1233_v49, %v412_v13  ;;  %v668_v13 = vld [vmem:[%s1280_s5 + $0x2] ss:$0 sm:$0xff] }
 0x200   :  { %v346_v16 = vmul.f32 %v659_v14, %v338_v12 }
 0x202   :  { %v340_v19 = vpop.permute.xlu1 %339  ;;  %v355_v25 = vadd.f32 %v353_v22, %v346_v16 }
 0x203   :  { %v347_v20 = vmul.f32 %v659_v14, %v340_v19  ;;  %v358_v21 = vpop.permute.xlu0 %357 }
 0x204   :  { %v366_v23 = vmul.f32 %v661_v17, %v358_v21  ;;  %v461_v21 = vmul.f32 %v660_v15, %v1178_v8 }
 0x205   :  { %v356_v26 = vadd.f32 %v354_v24, %v347_v20  ;;  %v460_v24 = vmul.f32 %v660_v15, %v1166_v5  ;;  %v482_v5 = vmul.f32 %v1221_v18, %v1096_v42 }
 0x206   :  { %v360_v35 = vpop.permute.xlu1 %359  ;;  %v368_v32 = vadd.f32 %v366_v23, %v355_v25 }
 0x207   :  { %v367_v27 = vmul.f32 %v661_v17, %v360_v35  ;;  %v373_v28 = vpop.permute.xlu0 %372 }
 0x208   :  { %v381_v34 = vmul.f32 %v662_v36, %v373_v28 }
 0x209   :  { %v369_v38 = vadd.f32 %v367_v27, %v356_v26 }
 0x20a   :  { %v477_v43 = vpop.permute.xlu1 %476  ;;  %v383_v44 = vadd.f32 %v381_v34, %v368_v32 }
 0x20b   :  { %v384_v47 = vadd.f32 %v382_v37, %v369_v38  ;;  %v395_v48 = vpop.permute.xlu0 %394  ;;  %v479_v28 = vmul.f32 %v662_v36, %v477_v43  ;;  %v483_v38 = vmul.f32 %v1221_v18, %v1094_v40  ;;  %v505_v18 = vmul.f32 %v666_v53, %v1198_v9 }
 0x20c   :  { %v392_v50 = vadd.f32 %v390_v39, %v383_v44  ;;  %v403_v51 = vmul.f32 %v664_v41, %v395_v48 }
 0x20d   :  { %v393_v33 = vadd.f32 %v391_v45, %v384_v47 }
 0x20e   :  { %v489_v54 = vpop.permute.xlu1 %488  ;;  %v405_v57 = vadd.f32 %v403_v51, %v392_v50 }
 0x20f   :  { %v410_v56 = vpop.permute.xlu0 %409  ;;  %v406_v31 = vadd.f32 %v404_v52, %v393_v33  ;;  %v491_v52 = vmul.f32 %v664_v41, %v489_v54 }
 0x210   :  { %v418_v58 = vmul.f32 %v1233_v49, %v410_v56 }
 0x211   :  { %v421_v61 = vadd.f32 %v419_v55, %v406_v31  ;;  %v504_v31 = vmul.f32 %v666_v53, %v1192_v29 }
 0x212   :  { %v455_v63 = vpop.permute.xlu1 %454  ;;  %v420_v0 = vadd.f32 %v418_v58, %v405_v57 }
 0x213   :  { %v432_v6 = vpop.permute.xlu0 %431  ;;  %v430_v7 = vadd.f32 %v428_v59, %v421_v61  ;;  %v458_v22 = vmul.f32 %v659_v14, %v455_v63 }
 0x214   :  { %v440_v10 = vmul.f32 %v667_v30, %v432_v6  ;;  %v429_v11 = vadd.f32 %v427_v62, %v420_v0 }
 0x215   :  { %v462_v32 = vadd.f32 %v460_v24, %v458_v22 }
 0x216   :  { %v457_v12 = vpop.permute.xlu1 %456  ;;  %v442_v19 = vadd.f32 %v440_v10, %v429_v11 }
 0x217   :  { %v459_v46 = vmul.f32 %v659_v14, %v457_v12  ;;  %v465_v16 = vpop.permute.xlu0 %464 }
 0x218   :  { %v448_v20 = vadd.f32 %v668_v13, %v442_v19  ;;  %v468_v26 = vmul.f32 %v661_v17, %v465_v16 }
 0x219   :  { %v463_v35 = vadd.f32 %v461_v21, %v459_v46 }
 0x21a   :  { %v467_v23 = vpop.permute.xlu1 %466  ;;  %v450_v60 = vmax.f32 %v448_v20, 0.0  ;;  %v470_v8 = vadd.f32 %v468_v26, %v462_v32 }
 0x21b   :  { %v469_v25 = vmul.f32 %v661_v17, %v467_v23  ;;  %v487_v27 = vpop.permute.xlu0 %486 }
 0x21c   :  { %784 = vmatprep.mubr.f32.mxu1 %v450_v60  ;;  %v490_v43 = vmul.f32 %v664_v41, %v487_v27 }
 0x21d   :  { %v471_v34 = vadd.f32 %v469_v25, %v463_v35 }
 0x21e   :  { %v475_v37 = vpop.permute.xlu1 %474 }
 0x21f   :  { %v481_v39 = vadd.f32 %v479_v28, %v471_v34  ;;  %v478_v44 = vmul.f32 %v662_v36, %v475_v37  ;;  %v434_v14 = vpop.permute.xlu0 %433 }
 0x220   :  { %v441_v45 = vmul.f32 %v667_v30, %v434_v14 }
 0x221   :  { %v480_v15 = vadd.f32 %v478_v44, %v470_v8  ;;  %v485_v47 = vadd.f32 %v483_v38, %v481_v39 }
 0x222   :  { %v497_v17 = vpop.permute.xlu1 %496  ;;  %v443_v48 = vadd.f32 %v441_v45, %v430_v7 }
 0x223   :  { %v484_v50 = vadd.f32 %v482_v5, %v480_v15  ;;  %v500_v33 = vmul.f32 %v1233_v49, %v497_v17  ;;  %v509_v56 = vpop.permute.xlu0 %508  ;;  %v493_v58 = vadd.f32 %v491_v52, %v485_v47 }
 0x224   :  { %v449_v51 = vadd.f32 %v668_v13, %v443_v48  ;;  %v512_v62 = vmul.f32 %v667_v30, %v509_v56 }
 0x225   :  { %v492_v55 = vadd.f32 %v490_v43, %v484_v50 }
 0x226   :  { %v499_v40 = vpop.permute.xlu1 %498  ;;  %v451_v36 = vmax.f32 %v449_v51, 0.0 }
 0x227   :  { %v502_v57 = vadd.f32 %v500_v33, %v492_v55  ;;  %v501_v42 = vmul.f32 %v1233_v49, %v499_v40  ;;  %v669_v49 = vld [vmem:[%s1280_s5 + $0x3] ss:$0 sm:$0xff] }
 0x228   :  { %785 = vmatmul.mubr.f32.vlgmr.msra.gmra.mrb[0].mxu1 %v451_v36 }
 0x229   :  { %v503_v59 = vadd.f32 %v501_v42, %v493_v58  ;;  %v506_v61 = vadd.f32 %v504_v31, %v502_v57 }
 0x22a   :  { %v511_v63 = vpop.permute.xlu1 %510 }
 0x22b   :  { %v507_v41 = vadd.f32 %v505_v18, %v503_v59  ;;  %v513_v54 = vmul.f32 %v667_v30, %v511_v63  ;;  %v514_v0 = vadd.f32 %v512_v62, %v506_v61 }
 0x22d   :  { %v515_v6 = vadd.f32 %v513_v54, %v507_v41  ;;  %v516_v7 = vadd.f32 %v668_v13, %v514_v0 }
 0x22f   :  { %v518_v10 = vmax.f32 %v516_v7, 0.0  ;;  %v517_v11 = vadd.f32 %v668_v13, %v515_v6 }
 0x231   :  { %787 = vmatprep.mubr.f32.mxu1 %v518_v10  ;;  %v519_v29 = vmax.f32 %v517_v11, 0.0 }
 0x233   :  { %788 = vmatmul.mubr.f32.gmra.mrb[2].mxu1 %v519_v29 }
 0x2fb   :  { %v786_v12 = vpop.f32.mrb[0].mxu1 }
 0x2fc   :  { %v612_v9 = vadd.f32 %v786_v12, %v669_v49  ;;  %v606_v53 = vpop.f32.mrb[1].mxu1 }
 0x2fd   :  { %v607_v19 = vadd.f32 %v669_v49, %v606_v53 }
 0x2fe   :  { %v628_v46 = vadd.f32 %v612_v9, %v907_v2 }
 0x2ff   :  { %v627_v30 = vadd.f32 %v607_v19, %v902_v1 }
 0x300   :  { %v630_v16 = vmax.f32 %v628_v46, 0.0 }
 0x301   :  { %v629_v20 = vmax.f32 %v627_v30, 0.0 }
 0x302   :  { %632 = vst [vmem:[%s1283_s6 + $0x8] sm:$0xff] %v630_v16 }
 0x303   :  { %631 = vst [vmem:[%s1283_s6] sm:$0xff] %v629_v20 }
 0x306   :  { %v789_v13 = vpop.f32.mrb[2].mxu1 }
 0x307   :  { %v622_v21 = vadd.f32 %v789_v13, %v669_v49  ;;  %v616_v22 = vpop.f32.mrb[3].mxu1 }
 0x308   :  { %v617_v23 = vadd.f32 %v669_v49, %v616_v22 }
 0x309   :  { %v636_v60 = vadd.f32 %v920_v4, %v622_v21 }
 0x30a   :  { %v635_v2 = vadd.f32 %v912_v3, %v617_v23 }
 0x30b   :  { %v638_v24 = vmax.f32 %v636_v60, 0.0 }
 0x30c   :  { %v637_v1 = vmax.f32 %v635_v2, 0.0 }
 0x30d   :  { %673 = vst [vmem:[%s1283_s6 + $0x18] sm:$0xff] %v638_v24 }
 0x30e   :  { %672 = vst [vmem:[%s1283_s6 + $0x10] sm:$0xff] %v637_v1 }

</bundles_post_ra>
